<compile_context>
chip_gen: v6e
topology: v6e:2x2x1
jax: 0.10.0
libtpu: 0.0.40
codegen_flags: <defaults>
</compile_context>

<pallas_src>
import math
import functools

import jax
import jax.numpy as jnp
from jax.experimental import pallas as pl
from jax.experimental.pallas import tpu as pltpu


# ------------------------------------------------------------------ helpers --

def _layer_norm(x, g, b, eps=1e-5):
    mu = jnp.mean(x, axis=-1, keepdims=True)
    var = jnp.mean((x - mu) ** 2, axis=-1, keepdims=True)
    return (x - mu) * jax.lax.rsqrt(var + eps) * g + b


def make_positional_encoding(d_model, max_len=256):
    position = jnp.arange(max_len, dtype=jnp.float32)[:, None]
    div_term = jnp.exp(jnp.arange(0, d_model, 2, dtype=jnp.float32)
                       * (-math.log(10000.0) / d_model))
    ang = position * div_term                                      # (max_len, d/2)
    pe = jnp.stack([jnp.sin(ang), jnp.cos(ang)], axis=-1)          # interleave sin/cos
    return pe.reshape(max_len, d_model)[None]                      # (1, max_len, d)


# ------------------------------------------------------------------- kernel --

def encoder_kernel(x_ref, pe_ref, mask_ref,
                   wqkv_ref, bqkv_ref, wo_ref, bo_ref,
                   g1_ref, be1_ref, w1_ref, b1_ref, w2_ref, b2_ref,
                   g2_ref, be2_ref, o_ref,
                   *, num_heads, num_layers, only_one):
    """One batch element per program: pos-enc + num_layers post-norm encoder layers."""
    S, D = pe_ref.shape
    H = num_heads
    dh = D // H
    scale = 1.0 / math.sqrt(dh)
    bf16 = jnp.bfloat16

    # positional encoding (fused elementwise add); activations stay f32
    x2 = x_ref[0] + pe_ref[...]                        # (S, D)
    mb = mask_ref[0]                                   # (1, S) additive key-padding bias

    def attention(q_slab, qkv, wo_l, bo_l):
        # q_slab: (R, 3D) rows producing queries; qkv: (S, 3D) source of keys/values.
        ctx_parts = []
        for h in range(H):                             # per-head 2-D dots (MXU, bf16 in / f32 acc)
            lo = h * dh
            qh = q_slab[:, lo:lo + dh].astype(bf16)            # (R, dh)
            kh = qkv[:, D + lo:D + lo + dh].astype(bf16)       # (S, dh)
            vh = qkv[:, 2 * D + lo:2 * D + lo + dh].astype(bf16)
            s = jnp.einsum('qd,kd->qk', qh, kh,
                           preferred_element_type=jnp.float32) * scale + mb
            s = s - jnp.max(s, axis=-1, keepdims=True)
            p = jnp.exp(s)
            p = p * pl.reciprocal(jnp.sum(p, axis=-1, keepdims=True), approx=True)
            ctx_parts.append(jnp.dot(p.astype(bf16), vh,
                                     preferred_element_type=jnp.float32))   # (R, dh)
        ctx = jnp.concatenate(ctx_parts, axis=-1)              # (R, D)
        # single out-projection matmul + bias
        return jnp.dot(ctx.astype(bf16), wo_l,
                       preferred_element_type=jnp.float32) + bo_l

    def ffn(xr, l):
        hid = jnp.dot(xr.astype(bf16), w1_ref[l],
                      preferred_element_type=jnp.float32) + b1_ref[l]
        hid = jnp.maximum(hid, 0.0)
        return jnp.dot(hid.astype(bf16), w2_ref[l],
                       preferred_element_type=jnp.float32) + b2_ref[l]

    for l in range(num_layers):                        # static unroll (L is small)
        last = (l == num_layers - 1)
        # fused Q/K/V projection: ONE (S,D)@(D,3D) MXU matmul + one bias add
        qkv = jnp.dot(x2.astype(bf16), wqkv_ref[l],
                      preferred_element_type=jnp.float32) + bqkv_ref[l]     # (S, 3D)

        if only_one and last:
            # output only needs sequence position 0: K/V use all S rows, everything
            # downstream (scores, ctx, out-proj, norms, FFN) runs on a single row.
            xr = x2[0:1, :]                                               # (1, D)
            attn = attention(qkv[0:1, :], qkv, wo_ref[l], bo_ref[l])
            xr = _layer_norm(xr + attn, g1_ref[l], be1_ref[l])
            xr = _layer_norm(xr + ffn(xr, l), g2_ref[l], be2_ref[l])
            o_ref[...] = xr.reshape(1, 1, D)
        else:
            attn = attention(qkv, qkv, wo_ref[l], bo_ref[l])
            x2 = _layer_norm(x2 + attn, g1_ref[l], be1_ref[l])
            x2 = _layer_norm(x2 + ffn(x2, l), g2_ref[l], be2_ref[l])

    if not only_one:
        o_ref[...] = x2.reshape(1, S, D)


# ------------------------------------------------------------------ wrapper --

def encoder_forward(emb, attention_mask, params, pe, num_heads, only_one=True):
    B, S, D = emb.shape
    L = len(params)
    pe_s = pe[0, :S, :]                                            # (S, D)

    if attention_mask is not None:
        # PyTorch: ~attention_mask used as key_padding_mask (True = ignore).
        mask_bias = jnp.where(attention_mask, 0.0, -1e30).astype(jnp.float32)
    else:
        mask_bias = jnp.zeros((B, S), jnp.float32)
    mask_bias = mask_bias.reshape(B, 1, S)

    # Host-side prep: stack across layers, pre-transpose to (in, out), fuse QKV,
    # cast matmul weights to bf16 (biases / LN params stay f32).
    stack = lambda f: jnp.stack([f(p) for p in params])
    wqkv = stack(lambda p: p["wqkv"].T).astype(jnp.bfloat16)       # (L, D, 3D)
    bqkv = stack(lambda p: p["bqkv"])                              # (L, 1, 3D)
    wo = stack(lambda p: p["wo"].T).astype(jnp.bfloat16)           # (L, D, D)
    bo = stack(lambda p: p["bo"])                                  # (L, 1, D)
    g1 = stack(lambda p: p["g1"]); be1 = stack(lambda p: p["be1"])
    w1 = stack(lambda p: p["w1"].T).astype(jnp.bfloat16)           # (L, D, F)
    b1 = stack(lambda p: p["b1"])                                  # (L, 1, F)
    w2 = stack(lambda p: p["w2"].T).astype(jnp.bfloat16)           # (L, F, D)
    b2 = stack(lambda p: p["b2"])                                  # (L, 1, D)
    g2 = stack(lambda p: p["g2"]); be2 = stack(lambda p: p["be2"])

    weights = (wqkv, bqkv, wo, bo, g1, be1, w1, b1, w2, b2, g2, be2)

    def resident(a):
        # whole array in VMEM, same block for every grid step (no re-DMA)
        nd = a.ndim

        def idx(b):
            return (0,) * nd

        return pl.BlockSpec(a.shape, idx)

    out_struct = jax.ShapeDtypeStruct((B, 1, D) if only_one else (B, S, D), jnp.float32)
    kernel = functools.partial(encoder_kernel, num_heads=num_heads,
                               num_layers=L, only_one=only_one)

    # TODO(synk): for much larger B*S/D/F/L, add vmem_limit_bytes and tile the row
    # dimension so the all-resident design fits v7x's 64 MiB VMEM.
    out = pl.pallas_call(
        kernel,
        out_shape=out_struct,
        grid=(B,),                                                 # batch-parallel (v7x: 2 TCs)
        in_specs=[pl.BlockSpec((1, S, D), lambda b: (b, 0, 0)),    # emb
                  pl.BlockSpec((S, D), lambda b: (0, 0)),          # pos-enc
                  pl.BlockSpec((1, 1, S), lambda b: (b, 0, 0))]    # key-padding bias
                 + [resident(w) for w in weights],
        out_specs=pl.BlockSpec((1, 1, D) if only_one else (1, S, D),
                               lambda b: (b, 0, 0)),
        compiler_params=pltpu.CompilerParams(
            dimension_semantics=("parallel",)),
    )(emb, pe_s, mask_bias, *weights)

    return out.reshape(B, D) if only_one else out


# --------------------------------------------------------------- parameters --

def init_params(key, d_model, ffn_size, num_layers):
    params = []
    for i in range(num_layers):
        ks = jax.random.split(jax.random.fold_in(key, i), 4)
        params.append(dict(
            wqkv=0.05 * jax.random.normal(ks[0], (3 * d_model, d_model), jnp.float32),
            bqkv=jnp.zeros((1, 3 * d_model), jnp.float32),
            wo=0.05 * jax.random.normal(ks[1], (d_model, d_model), jnp.float32),
            bo=jnp.zeros((1, d_model), jnp.float32),
            g1=jnp.ones((1, d_model), jnp.float32),
            be1=jnp.zeros((1, d_model), jnp.float32),
            w1=0.05 * jax.random.normal(ks[2], (ffn_size, d_model), jnp.float32),
            b1=jnp.zeros((1, ffn_size), jnp.float32),
            w2=0.05 * jax.random.normal(ks[3], (d_model, ffn_size), jnp.float32),
            b2=jnp.zeros((1, d_model), jnp.float32),
            g2=jnp.ones((1, d_model), jnp.float32),
            be2=jnp.zeros((1, d_model), jnp.float32),
        ))
    return params


# ----------------------------------------------------------- pure-JAX check --

def ref_forward(emb, attention_mask, params, pe, num_heads, only_one=True):
    B, S, D = emb.shape
    dh = D // num_heads
    x = emb + pe[:, :S]
    mb = jnp.where(attention_mask, 0.0, -1e30)[:, None, None, :]
    for p in params:
        qkv = x @ p["wqkv"].T + p["bqkv"][0]
        q, k, v = jnp.split(qkv, 3, axis=-1)
        q = q.reshape(B, S, num_heads, dh).transpose(0, 2, 1, 3)
        k = k.reshape(B, S, num_heads, dh).transpose(0, 2, 1, 3)
        v = v.reshape(B, S, num_heads, dh).transpose(0, 2, 1, 3)
        s = (q @ jnp.swapaxes(k, -1, -2)) / math.sqrt(dh) + mb
        a = jax.nn.softmax(s, axis=-1) @ v
        a = a.transpose(0, 2, 1, 3).reshape(B, S, D)
        a = a @ p["wo"].T + p["bo"][0]
        x = _layer_norm(x + a, p["g1"][0], p["be1"][0])
        h1 = jax.nn.relu(x @ p["w1"].T + p["b1"][0])
        ff = h1 @ p["w2"].T + p["b2"][0]
        x = _layer_norm(x + ff, p["g2"][0], p["be2"][0])
    if only_one:
        x = x[:, 0, :]
    return x


# --------------------------------------------------------------------- main --

if __name__ == "__main__":
    # config: emb_dim=32, num_heads=4, ffn_size=64, num_layers=2, max_len=256, only_one=True
    B, S, D, H, FFN, L = 2, 8, 32, 4, 64, 2

    key = jax.random.PRNGKey(0)
    k_emb, k_par = jax.random.split(key)

    emb = jax.random.normal(k_emb, (B, S, D), jnp.float32)
    attention_mask = jnp.array(
        [[True] * S,
         [True] * (S - 3) + [False] * 3])              # second example has 3 padding tokens

    pe = make_positional_encoding(D, max_len=256)
    params = init_params(k_par, D, FFN, L)

    out = encoder_forward(emb, attention_mask, params, pe, num_heads=H, only_one=True)
    out = jax.block_until_ready(out)

    ref = ref_forward(emb, attention_mask, params, pe, num_heads=H, only_one=True)
    assert out.shape == (B, D), out.shape
    # bf16 MXU inputs (f32 accumulation) vs the all-f32 reference -> slightly looser tol
    err = float(jnp.max(jnp.abs(out - ref)))
    assert jnp.allclose(out, ref, atol=3e-2, rtol=3e-2), err

    print("KERNEL_OK")
</pallas_src>

<mosaic_0001>
module attributes {stable_mosaic.version = 11 : i64} {
  func.func @encoder_kernel(%arg0: i32, %arg1: memref<1x8x32xf32, #tpu.memory_space<vmem>>, %arg2: memref<8x32xf32, #tpu.memory_space<vmem>>, %arg3: memref<1x1x8xf32, #tpu.memory_space<vmem>>, %arg4: memref<2x32x96xbf16, #tpu.memory_space<vmem>>, %arg5: memref<2x1x96xf32, #tpu.memory_space<vmem>>, %arg6: memref<2x32x32xbf16, #tpu.memory_space<vmem>>, %arg7: memref<2x1x32xf32, #tpu.memory_space<vmem>>, %arg8: memref<2x1x32xf32, #tpu.memory_space<vmem>>, %arg9: memref<2x1x32xf32, #tpu.memory_space<vmem>>, %arg10: memref<2x32x64xbf16, #tpu.memory_space<vmem>>, %arg11: memref<2x1x64xf32, #tpu.memory_space<vmem>>, %arg12: memref<2x64x32xbf16, #tpu.memory_space<vmem>>, %arg13: memref<2x1x32xf32, #tpu.memory_space<vmem>>, %arg14: memref<2x1x32xf32, #tpu.memory_space<vmem>>, %arg15: memref<2x1x32xf32, #tpu.memory_space<vmem>>, %arg16: memref<1x1x32xf32, #tpu.memory_space<vmem>>) attributes {dimension_semantics = [#tpu.dimension_semantics<parallel>], iteration_bounds = array<i64: 2>, scalar_prefetch = 0 : i64, scratch_operands = 0 : i64, tpu.core_type = #tpu.core_type<tc>, window_params = [{transform_indices = @transform_0, window_bounds = array<i64: 1, 8, 32>}, {pipeline_mode = #tpu.pipeline_mode<synchronous>, transform_indices = @transform_1, window_bounds = array<i64: 8, 32>}, {transform_indices = @transform_2, window_bounds = array<i64: 1, 1, 8>}, {pipeline_mode = #tpu.pipeline_mode<synchronous>, transform_indices = @transform_3, window_bounds = array<i64: 2, 32, 96>}, {pipeline_mode = #tpu.pipeline_mode<synchronous>, transform_indices = @transform_4, window_bounds = array<i64: 2, 1, 96>}, {pipeline_mode = #tpu.pipeline_mode<synchronous>, transform_indices = @transform_5, window_bounds = array<i64: 2, 32, 32>}, {pipeline_mode = #tpu.pipeline_mode<synchronous>, transform_indices = @transform_6, window_bounds = array<i64: 2, 1, 32>}, {pipeline_mode = #tpu.pipeline_mode<synchronous>, transform_indices = @transform_7, window_bounds = array<i64: 2, 1, 32>}, {pipeline_mode = #tpu.pipeline_mode<synchronous>, transform_indices = @transform_8, window_bounds = array<i64: 2, 1, 32>}, {pipeline_mode = #tpu.pipeline_mode<synchronous>, transform_indices = @transform_9, window_bounds = array<i64: 2, 32, 64>}, {pipeline_mode = #tpu.pipeline_mode<synchronous>, transform_indices = @transform_10, window_bounds = array<i64: 2, 1, 64>}, {pipeline_mode = #tpu.pipeline_mode<synchronous>, transform_indices = @transform_11, window_bounds = array<i64: 2, 64, 32>}, {pipeline_mode = #tpu.pipeline_mode<synchronous>, transform_indices = @transform_12, window_bounds = array<i64: 2, 1, 32>}, {pipeline_mode = #tpu.pipeline_mode<synchronous>, transform_indices = @transform_13, window_bounds = array<i64: 2, 1, 32>}, {pipeline_mode = #tpu.pipeline_mode<synchronous>, transform_indices = @transform_14, window_bounds = array<i64: 2, 1, 32>}, {transform_indices = @transform_15, window_bounds = array<i64: 1, 1, 32>}]} {
    %c0 = arith.constant 0 : index
    %c0_0 = arith.constant 0 : index
    %c0_1 = arith.constant 0 : index
    %0 = vector.load %arg1[%c0, %c0_0, %c0_1] : memref<1x8x32xf32, #tpu.memory_space<vmem>>, vector<1x8x32xf32>
    %1 = vector.shape_cast %0 : vector<1x8x32xf32> to vector<8x32xf32>
    %c0_2 = arith.constant 0 : index
    %c0_3 = arith.constant 0 : index
    %2 = vector.load %arg2[%c0_2, %c0_3] : memref<8x32xf32, #tpu.memory_space<vmem>>, vector<8x32xf32>
    %3 = arith.addf %1, %2 : vector<8x32xf32>
    %c0_4 = arith.constant 0 : index
    %c0_5 = arith.constant 0 : index
    %c0_6 = arith.constant 0 : index
    %4 = vector.load %arg3[%c0_4, %c0_5, %c0_6] : memref<1x1x8xf32, #tpu.memory_space<vmem>>, vector<1x1x8xf32>
    %5 = vector.shape_cast %4 : vector<1x1x8xf32> to vector<1x8xf32>
    %6 = arith.truncf %3 : vector<8x32xf32> to vector<8x32xbf16>
    %c0_7 = arith.constant 0 : index
    %c0_8 = arith.constant 0 : index
    %c0_9 = arith.constant 0 : index
    %7 = vector.load %arg4[%c0_7, %c0_8, %c0_9] : memref<2x32x96xbf16, #tpu.memory_space<vmem>>, vector<1x32x96xbf16>
    %8 = vector.shape_cast %7 : vector<1x32x96xbf16> to vector<32x96xbf16>
    %cst = arith.constant dense<0.000000e+00> : vector<8x96xf32>
    %9 = tpu.matmul %6, %8, %cst {dimension_numbers = #tpu.dot_dimension_numbers<[1], [0], [0], [1], [0, 0, 1, 1], [], []>} : vector<8x32xbf16>, vector<32x96xbf16>, vector<8x96xf32> -> vector<8x96xf32>
    %c0_10 = arith.constant 0 : index
    %c0_11 = arith.constant 0 : index
    %c0_12 = arith.constant 0 : index
    %10 = vector.load %arg5[%c0_10, %c0_11, %c0_12] : memref<2x1x96xf32, #tpu.memory_space<vmem>>, vector<1x1x96xf32>
    %11 = vector.shape_cast %10 : vector<1x1x96xf32> to vector<1x96xf32>
    %12 = vector.broadcast %11 : vector<1x96xf32> to vector<8x96xf32>
    %13 = arith.addf %9, %12 : vector<8x96xf32>
    %c0_13 = arith.constant 0 : index
    %c0_14 = arith.constant 0 : index
    %c0_15 = arith.constant 0 : index
    %14 = vector.load %arg6[%c0_13, %c0_14, %c0_15] : memref<2x32x32xbf16, #tpu.memory_space<vmem>>, vector<1x32x32xbf16>
    %15 = vector.shape_cast %14 : vector<1x32x32xbf16> to vector<32x32xbf16>
    %c0_16 = arith.constant 0 : index
    %c0_17 = arith.constant 0 : index
    %c0_18 = arith.constant 0 : index
    %16 = vector.load %arg7[%c0_16, %c0_17, %c0_18] : memref<2x1x32xf32, #tpu.memory_space<vmem>>, vector<1x1x32xf32>
    %17 = vector.shape_cast %16 : vector<1x1x32xf32> to vector<1x32xf32>
    %18 = vector.extract_strided_slice %13 {offsets = [0, 0], sizes = [8, 8], strides = [1, 1]} : vector<8x96xf32> to vector<8x8xf32>
    %19 = arith.truncf %18 : vector<8x8xf32> to vector<8x8xbf16>
    %20 = vector.extract_strided_slice %13 {offsets = [0, 32], sizes = [8, 8], strides = [1, 1]} : vector<8x96xf32> to vector<8x8xf32>
    %21 = arith.truncf %20 : vector<8x8xf32> to vector<8x8xbf16>
    %22 = vector.extract_strided_slice %13 {offsets = [0, 64], sizes = [8, 8], strides = [1, 1]} : vector<8x96xf32> to vector<8x8xf32>
    %23 = arith.truncf %22 : vector<8x8xf32> to vector<8x8xbf16>
    "tpu.trace_start"() <{level = 10 : i32, message = "qd,kd->qk"}> : () -> ()
    %cst_19 = arith.constant dense<0.000000e+00> : vector<8x8xf32>
    %24 = tpu.matmul %19, %21, %cst_19 {dimension_numbers = #tpu.dot_dimension_numbers<[1], [1], [0], [0], [0, 0, 1, 0], [], []>} : vector<8x8xbf16>, vector<8x8xbf16>, vector<8x8xf32> -> vector<8x8xf32>
    "tpu.trace_stop"() : () -> ()
    %cst_20 = arith.constant 0.353553385 : f32
    %25 = vector.broadcast %cst_20 : f32 to vector<8x8xf32>
    %26 = arith.mulf %24, %25 : vector<8x8xf32>
    %27 = vector.broadcast %5 : vector<1x8xf32> to vector<8x8xf32>
    %28 = arith.addf %26, %27 : vector<8x8xf32>
    %cst_21 = arith.constant dense<0xFF800000> : vector<8xf32>
    %29 = vector.multi_reduction <maximumf>, %28, %cst_21 [1] : vector<8x8xf32> to vector<8xf32>
    %30 = vector.shape_cast %29 : vector<8xf32> to vector<8x1xf32>
    %31 = vector.broadcast %30 : vector<8x1xf32> to vector<8x8xf32>
    %32 = arith.subf %28, %31 : vector<8x8xf32>
    %33 = math.exp %32 : vector<8x8xf32>
    %cst_22 = arith.constant dense<0.000000e+00> : vector<8xf32>
    %34 = vector.multi_reduction <add>, %33, %cst_22 [1] : vector<8x8xf32> to vector<8xf32>
    %35 = vector.shape_cast %34 : vector<8xf32> to vector<8x1xf32>
    %36 = tpu.reciprocal %35 {approx = true} : vector<8x1xf32> -> vector<8x1xf32>
    %37 = vector.broadcast %36 : vector<8x1xf32> to vector<8x8xf32>
    %38 = arith.mulf %33, %37 : vector<8x8xf32>
    %39 = arith.truncf %38 : vector<8x8xf32> to vector<8x8xbf16>
    %cst_23 = arith.constant dense<0.000000e+00> : vector<8x8xf32>
    %40 = tpu.matmul %39, %23, %cst_23 {dimension_numbers = #tpu.dot_dimension_numbers<[1], [0], [0], [1], [0, 0, 1, 1], [], []>} : vector<8x8xbf16>, vector<8x8xbf16>, vector<8x8xf32> -> vector<8x8xf32>
    %41 = vector.extract_strided_slice %13 {offsets = [0, 8], sizes = [8, 8], strides = [1, 1]} : vector<8x96xf32> to vector<8x8xf32>
    %42 = arith.truncf %41 : vector<8x8xf32> to vector<8x8xbf16>
    %43 = vector.extract_strided_slice %13 {offsets = [0, 40], sizes = [8, 8], strides = [1, 1]} : vector<8x96xf32> to vector<8x8xf32>
    %44 = arith.truncf %43 : vector<8x8xf32> to vector<8x8xbf16>
    %45 = vector.extract_strided_slice %13 {offsets = [0, 72], sizes = [8, 8], strides = [1, 1]} : vector<8x96xf32> to vector<8x8xf32>
    %46 = arith.truncf %45 : vector<8x8xf32> to vector<8x8xbf16>
    "tpu.trace_start"() <{level = 10 : i32, message = "qd,kd->qk"}> : () -> ()
    %cst_24 = arith.constant dense<0.000000e+00> : vector<8x8xf32>
    %47 = tpu.matmul %42, %44, %cst_24 {dimension_numbers = #tpu.dot_dimension_numbers<[1], [1], [0], [0], [0, 0, 1, 0], [], []>} : vector<8x8xbf16>, vector<8x8xbf16>, vector<8x8xf32> -> vector<8x8xf32>
    "tpu.trace_stop"() : () -> ()
    %cst_25 = arith.constant 0.353553385 : f32
    %48 = vector.broadcast %cst_25 : f32 to vector<8x8xf32>
    %49 = arith.mulf %47, %48 : vector<8x8xf32>
    %50 = vector.broadcast %5 : vector<1x8xf32> to vector<8x8xf32>
    %51 = arith.addf %49, %50 : vector<8x8xf32>
    %cst_26 = arith.constant dense<0xFF800000> : vector<8xf32>
    %52 = vector.multi_reduction <maximumf>, %51, %cst_26 [1] : vector<8x8xf32> to vector<8xf32>
    %53 = vector.shape_cast %52 : vector<8xf32> to vector<8x1xf32>
    %54 = vector.broadcast %53 : vector<8x1xf32> to vector<8x8xf32>
    %55 = arith.subf %51, %54 : vector<8x8xf32>
    %56 = math.exp %55 : vector<8x8xf32>
    %cst_27 = arith.constant dense<0.000000e+00> : vector<8xf32>
    %57 = vector.multi_reduction <add>, %56, %cst_27 [1] : vector<8x8xf32> to vector<8xf32>
    %58 = vector.shape_cast %57 : vector<8xf32> to vector<8x1xf32>
    %59 = tpu.reciprocal %58 {approx = true} : vector<8x1xf32> -> vector<8x1xf32>
    %60 = vector.broadcast %59 : vector<8x1xf32> to vector<8x8xf32>
    %61 = arith.mulf %56, %60 : vector<8x8xf32>
    %62 = arith.truncf %61 : vector<8x8xf32> to vector<8x8xbf16>
    %cst_28 = arith.constant dense<0.000000e+00> : vector<8x8xf32>
    %63 = tpu.matmul %62, %46, %cst_28 {dimension_numbers = #tpu.dot_dimension_numbers<[1], [0], [0], [1], [0, 0, 1, 1], [], []>} : vector<8x8xbf16>, vector<8x8xbf16>, vector<8x8xf32> -> vector<8x8xf32>
    %64 = vector.extract_strided_slice %13 {offsets = [0, 16], sizes = [8, 8], strides = [1, 1]} : vector<8x96xf32> to vector<8x8xf32>
    %65 = arith.truncf %64 : vector<8x8xf32> to vector<8x8xbf16>
    %66 = vector.extract_strided_slice %13 {offsets = [0, 48], sizes = [8, 8], strides = [1, 1]} : vector<8x96xf32> to vector<8x8xf32>
    %67 = arith.truncf %66 : vector<8x8xf32> to vector<8x8xbf16>
    %68 = vector.extract_strided_slice %13 {offsets = [0, 80], sizes = [8, 8], strides = [1, 1]} : vector<8x96xf32> to vector<8x8xf32>
    %69 = arith.truncf %68 : vector<8x8xf32> to vector<8x8xbf16>
    "tpu.trace_start"() <{level = 10 : i32, message = "qd,kd->qk"}> : () -> ()
    %cst_29 = arith.constant dense<0.000000e+00> : vector<8x8xf32>
    %70 = tpu.matmul %65, %67, %cst_29 {dimension_numbers = #tpu.dot_dimension_numbers<[1], [1], [0], [0], [0, 0, 1, 0], [], []>} : vector<8x8xbf16>, vector<8x8xbf16>, vector<8x8xf32> -> vector<8x8xf32>
    "tpu.trace_stop"() : () -> ()
    %cst_30 = arith.constant 0.353553385 : f32
    %71 = vector.broadcast %cst_30 : f32 to vector<8x8xf32>
    %72 = arith.mulf %70, %71 : vector<8x8xf32>
    %73 = vector.broadcast %5 : vector<1x8xf32> to vector<8x8xf32>
    %74 = arith.addf %72, %73 : vector<8x8xf32>
    %cst_31 = arith.constant dense<0xFF800000> : vector<8xf32>
    %75 = vector.multi_reduction <maximumf>, %74, %cst_31 [1] : vector<8x8xf32> to vector<8xf32>
    %76 = vector.shape_cast %75 : vector<8xf32> to vector<8x1xf32>
    %77 = vector.broadcast %76 : vector<8x1xf32> to vector<8x8xf32>
    %78 = arith.subf %74, %77 : vector<8x8xf32>
    %79 = math.exp %78 : vector<8x8xf32>
    %cst_32 = arith.constant dense<0.000000e+00> : vector<8xf32>
    %80 = vector.multi_reduction <add>, %79, %cst_32 [1] : vector<8x8xf32> to vector<8xf32>
    %81 = vector.shape_cast %80 : vector<8xf32> to vector<8x1xf32>
    %82 = tpu.reciprocal %81 {approx = true} : vector<8x1xf32> -> vector<8x1xf32>
    %83 = vector.broadcast %82 : vector<8x1xf32> to vector<8x8xf32>
    %84 = arith.mulf %79, %83 : vector<8x8xf32>
    %85 = arith.truncf %84 : vector<8x8xf32> to vector<8x8xbf16>
    %cst_33 = arith.constant dense<0.000000e+00> : vector<8x8xf32>
    %86 = tpu.matmul %85, %69, %cst_33 {dimension_numbers = #tpu.dot_dimension_numbers<[1], [0], [0], [1], [0, 0, 1, 1], [], []>} : vector<8x8xbf16>, vector<8x8xbf16>, vector<8x8xf32> -> vector<8x8xf32>
    %87 = vector.extract_strided_slice %13 {offsets = [0, 24], sizes = [8, 8], strides = [1, 1]} : vector<8x96xf32> to vector<8x8xf32>
    %88 = arith.truncf %87 : vector<8x8xf32> to vector<8x8xbf16>
    %89 = vector.extract_strided_slice %13 {offsets = [0, 56], sizes = [8, 8], strides = [1, 1]} : vector<8x96xf32> to vector<8x8xf32>
    %90 = arith.truncf %89 : vector<8x8xf32> to vector<8x8xbf16>
    %91 = vector.extract_strided_slice %13 {offsets = [0, 88], sizes = [8, 8], strides = [1, 1]} : vector<8x96xf32> to vector<8x8xf32>
    %92 = arith.truncf %91 : vector<8x8xf32> to vector<8x8xbf16>
    "tpu.trace_start"() <{level = 10 : i32, message = "qd,kd->qk"}> : () -> ()
    %cst_34 = arith.constant dense<0.000000e+00> : vector<8x8xf32>
    %93 = tpu.matmul %88, %90, %cst_34 {dimension_numbers = #tpu.dot_dimension_numbers<[1], [1], [0], [0], [0, 0, 1, 0], [], []>} : vector<8x8xbf16>, vector<8x8xbf16>, vector<8x8xf32> -> vector<8x8xf32>
    "tpu.trace_stop"() : () -> ()
    %cst_35 = arith.constant 0.353553385 : f32
    %94 = vector.broadcast %cst_35 : f32 to vector<8x8xf32>
    %95 = arith.mulf %93, %94 : vector<8x8xf32>
    %96 = vector.broadcast %5 : vector<1x8xf32> to vector<8x8xf32>
    %97 = arith.addf %95, %96 : vector<8x8xf32>
    %cst_36 = arith.constant dense<0xFF800000> : vector<8xf32>
    %98 = vector.multi_reduction <maximumf>, %97, %cst_36 [1] : vector<8x8xf32> to vector<8xf32>
    %99 = vector.shape_cast %98 : vector<8xf32> to vector<8x1xf32>
    %100 = vector.broadcast %99 : vector<8x1xf32> to vector<8x8xf32>
    %101 = arith.subf %97, %100 : vector<8x8xf32>
    %102 = math.exp %101 : vector<8x8xf32>
    %cst_37 = arith.constant dense<0.000000e+00> : vector<8xf32>
    %103 = vector.multi_reduction <add>, %102, %cst_37 [1] : vector<8x8xf32> to vector<8xf32>
    %104 = vector.shape_cast %103 : vector<8xf32> to vector<8x1xf32>
    %105 = tpu.reciprocal %104 {approx = true} : vector<8x1xf32> -> vector<8x1xf32>
    %106 = vector.broadcast %105 : vector<8x1xf32> to vector<8x8xf32>
    %107 = arith.mulf %102, %106 : vector<8x8xf32>
    %108 = arith.truncf %107 : vector<8x8xf32> to vector<8x8xbf16>
    %cst_38 = arith.constant dense<0.000000e+00> : vector<8x8xf32>
    %109 = tpu.matmul %108, %92, %cst_38 {dimension_numbers = #tpu.dot_dimension_numbers<[1], [0], [0], [1], [0, 0, 1, 1], [], []>} : vector<8x8xbf16>, vector<8x8xbf16>, vector<8x8xf32> -> vector<8x8xf32>
    %110 = tpu.concatenate %40, %63, %86, %109 in 1 : vector<8x8xf32>, vector<8x8xf32>, vector<8x8xf32>, vector<8x8xf32> -> vector<8x32xf32>
    %111 = arith.truncf %110 : vector<8x32xf32> to vector<8x32xbf16>
    %cst_39 = arith.constant dense<0.000000e+00> : vector<8x32xf32>
    %112 = tpu.matmul %111, %15, %cst_39 {dimension_numbers = #tpu.dot_dimension_numbers<[1], [0], [0], [1], [0, 0, 1, 1], [], []>} : vector<8x32xbf16>, vector<32x32xbf16>, vector<8x32xf32> -> vector<8x32xf32>
    %113 = vector.broadcast %17 : vector<1x32xf32> to vector<8x32xf32>
    %114 = arith.addf %112, %113 : vector<8x32xf32>
    %115 = arith.addf %3, %114 : vector<8x32xf32>
    %c0_40 = arith.constant 0 : index
    %c0_41 = arith.constant 0 : index
    %c0_42 = arith.constant 0 : index
    %116 = vector.load %arg8[%c0_40, %c0_41, %c0_42] : memref<2x1x32xf32, #tpu.memory_space<vmem>>, vector<1x1x32xf32>
    %117 = vector.shape_cast %116 : vector<1x1x32xf32> to vector<1x32xf32>
    %c0_43 = arith.constant 0 : index
    %c0_44 = arith.constant 0 : index
    %c0_45 = arith.constant 0 : index
    %118 = vector.load %arg9[%c0_43, %c0_44, %c0_45] : memref<2x1x32xf32, #tpu.memory_space<vmem>>, vector<1x1x32xf32>
    %119 = vector.shape_cast %118 : vector<1x1x32xf32> to vector<1x32xf32>
    %cst_46 = arith.constant dense<0.000000e+00> : vector<8xf32>
    %120 = vector.multi_reduction <add>, %115, %cst_46 [1] : vector<8x32xf32> to vector<8xf32>
    %121 = vector.shape_cast %120 : vector<8xf32> to vector<8x1xf32>
    %cst_47 = arith.constant 3.200000e+01 : f32
    %122 = vector.broadcast %cst_47 : f32 to vector<8x1xf32>
    %123 = arith.divf %121, %122 : vector<8x1xf32>
    %124 = vector.broadcast %123 : vector<8x1xf32> to vector<8x32xf32>
    %125 = arith.subf %115, %124 : vector<8x32xf32>
    %126 = arith.mulf %125, %125 : vector<8x32xf32>
    %cst_48 = arith.constant dense<0.000000e+00> : vector<8xf32>
    %127 = vector.multi_reduction <add>, %126, %cst_48 [1] : vector<8x32xf32> to vector<8xf32>
    %128 = vector.shape_cast %127 : vector<8xf32> to vector<8x1xf32>
    %cst_49 = arith.constant 3.200000e+01 : f32
    %129 = vector.broadcast %cst_49 : f32 to vector<8x1xf32>
    %130 = arith.divf %128, %129 : vector<8x1xf32>
    %131 = vector.broadcast %123 : vector<8x1xf32> to vector<8x32xf32>
    %132 = arith.subf %115, %131 : vector<8x32xf32>
    %cst_50 = arith.constant 9.99999974E-6 : f32
    %133 = vector.broadcast %cst_50 : f32 to vector<8x1xf32>
    %134 = arith.addf %130, %133 : vector<8x1xf32>
    %135 = math.rsqrt %134 : vector<8x1xf32>
    %136 = vector.broadcast %135 : vector<8x1xf32> to vector<8x32xf32>
    %137 = arith.mulf %132, %136 : vector<8x32xf32>
    %138 = vector.broadcast %117 : vector<1x32xf32> to vector<8x32xf32>
    %139 = arith.mulf %137, %138 : vector<8x32xf32>
    %140 = vector.broadcast %119 : vector<1x32xf32> to vector<8x32xf32>
    %141 = arith.addf %139, %140 : vector<8x32xf32>
    %142 = arith.truncf %141 : vector<8x32xf32> to vector<8x32xbf16>
    %c0_51 = arith.constant 0 : index
    %c0_52 = arith.constant 0 : index
    %c0_53 = arith.constant 0 : index
    %143 = vector.load %arg10[%c0_51, %c0_52, %c0_53] : memref<2x32x64xbf16, #tpu.memory_space<vmem>>, vector<1x32x64xbf16>
    %144 = vector.shape_cast %143 : vector<1x32x64xbf16> to vector<32x64xbf16>
    %cst_54 = arith.constant dense<0.000000e+00> : vector<8x64xf32>
    %145 = tpu.matmul %142, %144, %cst_54 {dimension_numbers = #tpu.dot_dimension_numbers<[1], [0], [0], [1], [0, 0, 1, 1], [], []>} : vector<8x32xbf16>, vector<32x64xbf16>, vector<8x64xf32> -> vector<8x64xf32>
    %c0_55 = arith.constant 0 : index
    %c0_56 = arith.constant 0 : index
    %c0_57 = arith.constant 0 : index
    %146 = vector.load %arg11[%c0_55, %c0_56, %c0_57] : memref<2x1x64xf32, #tpu.memory_space<vmem>>, vector<1x1x64xf32>
    %147 = vector.shape_cast %146 : vector<1x1x64xf32> to vector<1x64xf32>
    %148 = vector.broadcast %147 : vector<1x64xf32> to vector<8x64xf32>
    %149 = arith.addf %145, %148 : vector<8x64xf32>
    %cst_58 = arith.constant 0.000000e+00 : f32
    %150 = vector.broadcast %cst_58 : f32 to vector<8x64xf32>
    %151 = arith.maximumf %149, %150 : vector<8x64xf32>
    %152 = arith.truncf %151 : vector<8x64xf32> to vector<8x64xbf16>
    %c0_59 = arith.constant 0 : index
    %c0_60 = arith.constant 0 : index
    %c0_61 = arith.constant 0 : index
    %153 = vector.load %arg12[%c0_59, %c0_60, %c0_61] : memref<2x64x32xbf16, #tpu.memory_space<vmem>>, vector<1x64x32xbf16>
    %154 = vector.shape_cast %153 : vector<1x64x32xbf16> to vector<64x32xbf16>
    %cst_62 = arith.constant dense<0.000000e+00> : vector<8x32xf32>
    %155 = tpu.matmul %152, %154, %cst_62 {dimension_numbers = #tpu.dot_dimension_numbers<[1], [0], [0], [1], [0, 0, 1, 1], [], []>} : vector<8x64xbf16>, vector<64x32xbf16>, vector<8x32xf32> -> vector<8x32xf32>
    %c0_63 = arith.constant 0 : index
    %c0_64 = arith.constant 0 : index
    %c0_65 = arith.constant 0 : index
    %156 = vector.load %arg13[%c0_63, %c0_64, %c0_65] : memref<2x1x32xf32, #tpu.memory_space<vmem>>, vector<1x1x32xf32>
    %157 = vector.shape_cast %156 : vector<1x1x32xf32> to vector<1x32xf32>
    %158 = vector.broadcast %157 : vector<1x32xf32> to vector<8x32xf32>
    %159 = arith.addf %155, %158 : vector<8x32xf32>
    %160 = arith.addf %141, %159 : vector<8x32xf32>
    %c0_66 = arith.constant 0 : index
    %c0_67 = arith.constant 0 : index
    %c0_68 = arith.constant 0 : index
    %161 = vector.load %arg14[%c0_66, %c0_67, %c0_68] : memref<2x1x32xf32, #tpu.memory_space<vmem>>, vector<1x1x32xf32>
    %162 = vector.shape_cast %161 : vector<1x1x32xf32> to vector<1x32xf32>
    %c0_69 = arith.constant 0 : index
    %c0_70 = arith.constant 0 : index
    %c0_71 = arith.constant 0 : index
    %163 = vector.load %arg15[%c0_69, %c0_70, %c0_71] : memref<2x1x32xf32, #tpu.memory_space<vmem>>, vector<1x1x32xf32>
    %164 = vector.shape_cast %163 : vector<1x1x32xf32> to vector<1x32xf32>
    %cst_72 = arith.constant dense<0.000000e+00> : vector<8xf32>
    %165 = vector.multi_reduction <add>, %160, %cst_72 [1] : vector<8x32xf32> to vector<8xf32>
    %166 = vector.shape_cast %165 : vector<8xf32> to vector<8x1xf32>
    %cst_73 = arith.constant 3.200000e+01 : f32
    %167 = vector.broadcast %cst_73 : f32 to vector<8x1xf32>
    %168 = arith.divf %166, %167 : vector<8x1xf32>
    %169 = vector.broadcast %168 : vector<8x1xf32> to vector<8x32xf32>
    %170 = arith.subf %160, %169 : vector<8x32xf32>
    %171 = arith.mulf %170, %170 : vector<8x32xf32>
    %cst_74 = arith.constant dense<0.000000e+00> : vector<8xf32>
    %172 = vector.multi_reduction <add>, %171, %cst_74 [1] : vector<8x32xf32> to vector<8xf32>
    %173 = vector.shape_cast %172 : vector<8xf32> to vector<8x1xf32>
    %cst_75 = arith.constant 3.200000e+01 : f32
    %174 = vector.broadcast %cst_75 : f32 to vector<8x1xf32>
    %175 = arith.divf %173, %174 : vector<8x1xf32>
    %176 = vector.broadcast %168 : vector<8x1xf32> to vector<8x32xf32>
    %177 = arith.subf %160, %176 : vector<8x32xf32>
    %cst_76 = arith.constant 9.99999974E-6 : f32
    %178 = vector.broadcast %cst_76 : f32 to vector<8x1xf32>
    %179 = arith.addf %175, %178 : vector<8x1xf32>
    %180 = math.rsqrt %179 : vector<8x1xf32>
    %181 = vector.broadcast %180 : vector<8x1xf32> to vector<8x32xf32>
    %182 = arith.mulf %177, %181 : vector<8x32xf32>
    %183 = vector.broadcast %162 : vector<1x32xf32> to vector<8x32xf32>
    %184 = arith.mulf %182, %183 : vector<8x32xf32>
    %185 = vector.broadcast %164 : vector<1x32xf32> to vector<8x32xf32>
    %186 = arith.addf %184, %185 : vector<8x32xf32>
    %187 = arith.truncf %186 : vector<8x32xf32> to vector<8x32xbf16>
    %c1 = arith.constant 1 : index
    %c0_77 = arith.constant 0 : index
    %c0_78 = arith.constant 0 : index
    %188 = vector.load %arg4[%c1, %c0_77, %c0_78] : memref<2x32x96xbf16, #tpu.memory_space<vmem>>, vector<1x32x96xbf16>
    %189 = vector.shape_cast %188 : vector<1x32x96xbf16> to vector<32x96xbf16>
    %cst_79 = arith.constant dense<0.000000e+00> : vector<8x96xf32>
    %190 = tpu.matmul %187, %189, %cst_79 {dimension_numbers = #tpu.dot_dimension_numbers<[1], [0], [0], [1], [0, 0, 1, 1], [], []>} : vector<8x32xbf16>, vector<32x96xbf16>, vector<8x96xf32> -> vector<8x96xf32>
    %c1_80 = arith.constant 1 : index
    %c0_81 = arith.constant 0 : index
    %c0_82 = arith.constant 0 : index
    %191 = vector.load %arg5[%c1_80, %c0_81, %c0_82] : memref<2x1x96xf32, #tpu.memory_space<vmem>>, vector<1x1x96xf32>
    %192 = vector.shape_cast %191 : vector<1x1x96xf32> to vector<1x96xf32>
    %193 = vector.broadcast %192 : vector<1x96xf32> to vector<8x96xf32>
    %194 = arith.addf %190, %193 : vector<8x96xf32>
    %195 = vector.extract_strided_slice %186 {offsets = [0, 0], sizes = [1, 32], strides = [1, 1]} : vector<8x32xf32> to vector<1x32xf32>
    %196 = vector.extract_strided_slice %194 {offsets = [0, 0], sizes = [1, 96], strides = [1, 1]} : vector<8x96xf32> to vector<1x96xf32>
    %c1_83 = arith.constant 1 : index
    %c0_84 = arith.constant 0 : index
    %c0_85 = arith.constant 0 : index
    %197 = vector.load %arg6[%c1_83, %c0_84, %c0_85] : memref<2x32x32xbf16, #tpu.memory_space<vmem>>, vector<1x32x32xbf16>
    %198 = vector.shape_cast %197 : vector<1x32x32xbf16> to vector<32x32xbf16>
    %c1_86 = arith.constant 1 : index
    %c0_87 = arith.constant 0 : index
    %c0_88 = arith.constant 0 : index
    %199 = vector.load %arg7[%c1_86, %c0_87, %c0_88] : memref<2x1x32xf32, #tpu.memory_space<vmem>>, vector<1x1x32xf32>
    %200 = vector.shape_cast %199 : vector<1x1x32xf32> to vector<1x32xf32>
    %201 = vector.extract_strided_slice %196 {offsets = [0, 0], sizes = [1, 8], strides = [1, 1]} : vector<1x96xf32> to vector<1x8xf32>
    %202 = arith.truncf %201 : vector<1x8xf32> to vector<1x8xbf16>
    %203 = vector.extract_strided_slice %194 {offsets = [0, 32], sizes = [8, 8], strides = [1, 1]} : vector<8x96xf32> to vector<8x8xf32>
    %204 = arith.truncf %203 : vector<8x8xf32> to vector<8x8xbf16>
    %205 = vector.extract_strided_slice %194 {offsets = [0, 64], sizes = [8, 8], strides = [1, 1]} : vector<8x96xf32> to vector<8x8xf32>
    %206 = arith.truncf %205 : vector<8x8xf32> to vector<8x8xbf16>
    "tpu.trace_start"() <{level = 10 : i32, message = "qd,kd->qk"}> : () -> ()
    %cst_89 = arith.constant dense<0.000000e+00> : vector<1x8xf32>
    %207 = tpu.matmul %202, %204, %cst_89 {dimension_numbers = #tpu.dot_dimension_numbers<[1], [1], [0], [0], [0, 0, 1, 0], [], []>} : vector<1x8xbf16>, vector<8x8xbf16>, vector<1x8xf32> -> vector<1x8xf32>
    "tpu.trace_stop"() : () -> ()
    %cst_90 = arith.constant 0.353553385 : f32
    %208 = vector.broadcast %cst_90 : f32 to vector<1x8xf32>
    %209 = arith.mulf %207, %208 : vector<1x8xf32>
    %210 = arith.addf %209, %5 : vector<1x8xf32>
    %cst_91 = arith.constant dense<0xFF800000> : vector<1xf32>
    %211 = vector.multi_reduction <maximumf>, %210, %cst_91 [1] : vector<1x8xf32> to vector<1xf32>
    %212 = vector.shape_cast %211 : vector<1xf32> to vector<1x1xf32>
    %213 = vector.broadcast %212 : vector<1x1xf32> to vector<1x8xf32>
    %214 = arith.subf %210, %213 : vector<1x8xf32>
    %215 = math.exp %214 : vector<1x8xf32>
    %cst_92 = arith.constant dense<0.000000e+00> : vector<1xf32>
    %216 = vector.multi_reduction <add>, %215, %cst_92 [1] : vector<1x8xf32> to vector<1xf32>
    %217 = vector.shape_cast %216 : vector<1xf32> to vector<1x1xf32>
    %218 = tpu.reciprocal %217 {approx = true} : vector<1x1xf32> -> vector<1x1xf32>
    %219 = vector.broadcast %218 : vector<1x1xf32> to vector<1x8xf32>
    %220 = arith.mulf %215, %219 : vector<1x8xf32>
    %221 = arith.truncf %220 : vector<1x8xf32> to vector<1x8xbf16>
    %cst_93 = arith.constant dense<0.000000e+00> : vector<1x8xf32>
    %222 = tpu.matmul %221, %206, %cst_93 {dimension_numbers = #tpu.dot_dimension_numbers<[1], [0], [0], [1], [0, 0, 1, 1], [], []>} : vector<1x8xbf16>, vector<8x8xbf16>, vector<1x8xf32> -> vector<1x8xf32>
    %223 = vector.extract_strided_slice %196 {offsets = [0, 8], sizes = [1, 8], strides = [1, 1]} : vector<1x96xf32> to vector<1x8xf32>
    %224 = arith.truncf %223 : vector<1x8xf32> to vector<1x8xbf16>
    %225 = vector.extract_strided_slice %194 {offsets = [0, 40], sizes = [8, 8], strides = [1, 1]} : vector<8x96xf32> to vector<8x8xf32>
    %226 = arith.truncf %225 : vector<8x8xf32> to vector<8x8xbf16>
    %227 = vector.extract_strided_slice %194 {offsets = [0, 72], sizes = [8, 8], strides = [1, 1]} : vector<8x96xf32> to vector<8x8xf32>
    %228 = arith.truncf %227 : vector<8x8xf32> to vector<8x8xbf16>
    "tpu.trace_start"() <{level = 10 : i32, message = "qd,kd->qk"}> : () -> ()
    %cst_94 = arith.constant dense<0.000000e+00> : vector<1x8xf32>
    %229 = tpu.matmul %224, %226, %cst_94 {dimension_numbers = #tpu.dot_dimension_numbers<[1], [1], [0], [0], [0, 0, 1, 0], [], []>} : vector<1x8xbf16>, vector<8x8xbf16>, vector<1x8xf32> -> vector<1x8xf32>
    "tpu.trace_stop"() : () -> ()
    %cst_95 = arith.constant 0.353553385 : f32
    %230 = vector.broadcast %cst_95 : f32 to vector<1x8xf32>
    %231 = arith.mulf %229, %230 : vector<1x8xf32>
    %232 = arith.addf %231, %5 : vector<1x8xf32>
    %cst_96 = arith.constant dense<0xFF800000> : vector<1xf32>
    %233 = vector.multi_reduction <maximumf>, %232, %cst_96 [1] : vector<1x8xf32> to vector<1xf32>
    %234 = vector.shape_cast %233 : vector<1xf32> to vector<1x1xf32>
    %235 = vector.broadcast %234 : vector<1x1xf32> to vector<1x8xf32>
    %236 = arith.subf %232, %235 : vector<1x8xf32>
    %237 = math.exp %236 : vector<1x8xf32>
    %cst_97 = arith.constant dense<0.000000e+00> : vector<1xf32>
    %238 = vector.multi_reduction <add>, %237, %cst_97 [1] : vector<1x8xf32> to vector<1xf32>
    %239 = vector.shape_cast %238 : vector<1xf32> to vector<1x1xf32>
    %240 = tpu.reciprocal %239 {approx = true} : vector<1x1xf32> -> vector<1x1xf32>
    %241 = vector.broadcast %240 : vector<1x1xf32> to vector<1x8xf32>
    %242 = arith.mulf %237, %241 : vector<1x8xf32>
    %243 = arith.truncf %242 : vector<1x8xf32> to vector<1x8xbf16>
    %cst_98 = arith.constant dense<0.000000e+00> : vector<1x8xf32>
    %244 = tpu.matmul %243, %228, %cst_98 {dimension_numbers = #tpu.dot_dimension_numbers<[1], [0], [0], [1], [0, 0, 1, 1], [], []>} : vector<1x8xbf16>, vector<8x8xbf16>, vector<1x8xf32> -> vector<1x8xf32>
    %245 = vector.extract_strided_slice %196 {offsets = [0, 16], sizes = [1, 8], strides = [1, 1]} : vector<1x96xf32> to vector<1x8xf32>
    %246 = arith.truncf %245 : vector<1x8xf32> to vector<1x8xbf16>
    %247 = vector.extract_strided_slice %194 {offsets = [0, 48], sizes = [8, 8], strides = [1, 1]} : vector<8x96xf32> to vector<8x8xf32>
    %248 = arith.truncf %247 : vector<8x8xf32> to vector<8x8xbf16>
    %249 = vector.extract_strided_slice %194 {offsets = [0, 80], sizes = [8, 8], strides = [1, 1]} : vector<8x96xf32> to vector<8x8xf32>
    %250 = arith.truncf %249 : vector<8x8xf32> to vector<8x8xbf16>
    "tpu.trace_start"() <{level = 10 : i32, message = "qd,kd->qk"}> : () -> ()
    %cst_99 = arith.constant dense<0.000000e+00> : vector<1x8xf32>
    %251 = tpu.matmul %246, %248, %cst_99 {dimension_numbers = #tpu.dot_dimension_numbers<[1], [1], [0], [0], [0, 0, 1, 0], [], []>} : vector<1x8xbf16>, vector<8x8xbf16>, vector<1x8xf32> -> vector<1x8xf32>
    "tpu.trace_stop"() : () -> ()
    %cst_100 = arith.constant 0.353553385 : f32
    %252 = vector.broadcast %cst_100 : f32 to vector<1x8xf32>
    %253 = arith.mulf %251, %252 : vector<1x8xf32>
    %254 = arith.addf %253, %5 : vector<1x8xf32>
    %cst_101 = arith.constant dense<0xFF800000> : vector<1xf32>
    %255 = vector.multi_reduction <maximumf>, %254, %cst_101 [1] : vector<1x8xf32> to vector<1xf32>
    %256 = vector.shape_cast %255 : vector<1xf32> to vector<1x1xf32>
    %257 = vector.broadcast %256 : vector<1x1xf32> to vector<1x8xf32>
    %258 = arith.subf %254, %257 : vector<1x8xf32>
    %259 = math.exp %258 : vector<1x8xf32>
    %cst_102 = arith.constant dense<0.000000e+00> : vector<1xf32>
    %260 = vector.multi_reduction <add>, %259, %cst_102 [1] : vector<1x8xf32> to vector<1xf32>
    %261 = vector.shape_cast %260 : vector<1xf32> to vector<1x1xf32>
    %262 = tpu.reciprocal %261 {approx = true} : vector<1x1xf32> -> vector<1x1xf32>
    %263 = vector.broadcast %262 : vector<1x1xf32> to vector<1x8xf32>
    %264 = arith.mulf %259, %263 : vector<1x8xf32>
    %265 = arith.truncf %264 : vector<1x8xf32> to vector<1x8xbf16>
    %cst_103 = arith.constant dense<0.000000e+00> : vector<1x8xf32>
    %266 = tpu.matmul %265, %250, %cst_103 {dimension_numbers = #tpu.dot_dimension_numbers<[1], [0], [0], [1], [0, 0, 1, 1], [], []>} : vector<1x8xbf16>, vector<8x8xbf16>, vector<1x8xf32> -> vector<1x8xf32>
    %267 = vector.extract_strided_slice %196 {offsets = [0, 24], sizes = [1, 8], strides = [1, 1]} : vector<1x96xf32> to vector<1x8xf32>
    %268 = arith.truncf %267 : vector<1x8xf32> to vector<1x8xbf16>
    %269 = vector.extract_strided_slice %194 {offsets = [0, 56], sizes = [8, 8], strides = [1, 1]} : vector<8x96xf32> to vector<8x8xf32>
    %270 = arith.truncf %269 : vector<8x8xf32> to vector<8x8xbf16>
    %271 = vector.extract_strided_slice %194 {offsets = [0, 88], sizes = [8, 8], strides = [1, 1]} : vector<8x96xf32> to vector<8x8xf32>
    %272 = arith.truncf %271 : vector<8x8xf32> to vector<8x8xbf16>
    "tpu.trace_start"() <{level = 10 : i32, message = "qd,kd->qk"}> : () -> ()
    %cst_104 = arith.constant dense<0.000000e+00> : vector<1x8xf32>
    %273 = tpu.matmul %268, %270, %cst_104 {dimension_numbers = #tpu.dot_dimension_numbers<[1], [1], [0], [0], [0, 0, 1, 0], [], []>} : vector<1x8xbf16>, vector<8x8xbf16>, vector<1x8xf32> -> vector<1x8xf32>
    "tpu.trace_stop"() : () -> ()
    %cst_105 = arith.constant 0.353553385 : f32
    %274 = vector.broadcast %cst_105 : f32 to vector<1x8xf32>
    %275 = arith.mulf %273, %274 : vector<1x8xf32>
    %276 = arith.addf %275, %5 : vector<1x8xf32>
    %cst_106 = arith.constant dense<0xFF800000> : vector<1xf32>
    %277 = vector.multi_reduction <maximumf>, %276, %cst_106 [1] : vector<1x8xf32> to vector<1xf32>
    %278 = vector.shape_cast %277 : vector<1xf32> to vector<1x1xf32>
    %279 = vector.broadcast %278 : vector<1x1xf32> to vector<1x8xf32>
    %280 = arith.subf %276, %279 : vector<1x8xf32>
    %281 = math.exp %280 : vector<1x8xf32>
    %cst_107 = arith.constant dense<0.000000e+00> : vector<1xf32>
    %282 = vector.multi_reduction <add>, %281, %cst_107 [1] : vector<1x8xf32> to vector<1xf32>
    %283 = vector.shape_cast %282 : vector<1xf32> to vector<1x1xf32>
    %284 = tpu.reciprocal %283 {approx = true} : vector<1x1xf32> -> vector<1x1xf32>
    %285 = vector.broadcast %284 : vector<1x1xf32> to vector<1x8xf32>
    %286 = arith.mulf %281, %285 : vector<1x8xf32>
    %287 = arith.truncf %286 : vector<1x8xf32> to vector<1x8xbf16>
    %cst_108 = arith.constant dense<0.000000e+00> : vector<1x8xf32>
    %288 = tpu.matmul %287, %272, %cst_108 {dimension_numbers = #tpu.dot_dimension_numbers<[1], [0], [0], [1], [0, 0, 1, 1], [], []>} : vector<1x8xbf16>, vector<8x8xbf16>, vector<1x8xf32> -> vector<1x8xf32>
    %289 = tpu.concatenate %222, %244, %266, %288 in 1 : vector<1x8xf32>, vector<1x8xf32>, vector<1x8xf32>, vector<1x8xf32> -> vector<1x32xf32>
    %290 = arith.truncf %289 : vector<1x32xf32> to vector<1x32xbf16>
    %cst_109 = arith.constant dense<0.000000e+00> : vector<1x32xf32>
    %291 = tpu.matmul %290, %198, %cst_109 {dimension_numbers = #tpu.dot_dimension_numbers<[1], [0], [0], [1], [0, 0, 1, 1], [], []>} : vector<1x32xbf16>, vector<32x32xbf16>, vector<1x32xf32> -> vector<1x32xf32>
    %292 = arith.addf %291, %200 : vector<1x32xf32>
    %293 = arith.addf %195, %292 : vector<1x32xf32>
    %c1_110 = arith.constant 1 : index
    %c0_111 = arith.constant 0 : index
    %c0_112 = arith.constant 0 : index
    %294 = vector.load %arg8[%c1_110, %c0_111, %c0_112] : memref<2x1x32xf32, #tpu.memory_space<vmem>>, vector<1x1x32xf32>
    %295 = vector.shape_cast %294 : vector<1x1x32xf32> to vector<1x32xf32>
    %c1_113 = arith.constant 1 : index
    %c0_114 = arith.constant 0 : index
    %c0_115 = arith.constant 0 : index
    %296 = vector.load %arg9[%c1_113, %c0_114, %c0_115] : memref<2x1x32xf32, #tpu.memory_space<vmem>>, vector<1x1x32xf32>
    %297 = vector.shape_cast %296 : vector<1x1x32xf32> to vector<1x32xf32>
    %cst_116 = arith.constant dense<0.000000e+00> : vector<1xf32>
    %298 = vector.multi_reduction <add>, %293, %cst_116 [1] : vector<1x32xf32> to vector<1xf32>
    %299 = vector.shape_cast %298 : vector<1xf32> to vector<1x1xf32>
    %cst_117 = arith.constant 3.200000e+01 : f32
    %300 = vector.broadcast %cst_117 : f32 to vector<1x1xf32>
    %301 = arith.divf %299, %300 : vector<1x1xf32>
    %302 = vector.broadcast %301 : vector<1x1xf32> to vector<1x32xf32>
    %303 = arith.subf %293, %302 : vector<1x32xf32>
    %304 = arith.mulf %303, %303 : vector<1x32xf32>
    %cst_118 = arith.constant dense<0.000000e+00> : vector<1xf32>
    %305 = vector.multi_reduction <add>, %304, %cst_118 [1] : vector<1x32xf32> to vector<1xf32>
    %306 = vector.shape_cast %305 : vector<1xf32> to vector<1x1xf32>
    %cst_119 = arith.constant 3.200000e+01 : f32
    %307 = vector.broadcast %cst_119 : f32 to vector<1x1xf32>
    %308 = arith.divf %306, %307 : vector<1x1xf32>
    %309 = vector.broadcast %301 : vector<1x1xf32> to vector<1x32xf32>
    %310 = arith.subf %293, %309 : vector<1x32xf32>
    %cst_120 = arith.constant 9.99999974E-6 : f32
    %311 = vector.broadcast %cst_120 : f32 to vector<1x1xf32>
    %312 = arith.addf %308, %311 : vector<1x1xf32>
    %313 = math.rsqrt %312 : vector<1x1xf32>
    %314 = vector.broadcast %313 : vector<1x1xf32> to vector<1x32xf32>
    %315 = arith.mulf %310, %314 : vector<1x32xf32>
    %316 = arith.mulf %315, %295 : vector<1x32xf32>
    %317 = arith.addf %316, %297 : vector<1x32xf32>
    %318 = arith.truncf %317 : vector<1x32xf32> to vector<1x32xbf16>
    %c1_121 = arith.constant 1 : index
    %c0_122 = arith.constant 0 : index
    %c0_123 = arith.constant 0 : index
    %319 = vector.load %arg10[%c1_121, %c0_122, %c0_123] : memref<2x32x64xbf16, #tpu.memory_space<vmem>>, vector<1x32x64xbf16>
    %320 = vector.shape_cast %319 : vector<1x32x64xbf16> to vector<32x64xbf16>
    %cst_124 = arith.constant dense<0.000000e+00> : vector<1x64xf32>
    %321 = tpu.matmul %318, %320, %cst_124 {dimension_numbers = #tpu.dot_dimension_numbers<[1], [0], [0], [1], [0, 0, 1, 1], [], []>} : vector<1x32xbf16>, vector<32x64xbf16>, vector<1x64xf32> -> vector<1x64xf32>
    %c1_125 = arith.constant 1 : index
    %c0_126 = arith.constant 0 : index
    %c0_127 = arith.constant 0 : index
    %322 = vector.load %arg11[%c1_125, %c0_126, %c0_127] : memref<2x1x64xf32, #tpu.memory_space<vmem>>, vector<1x1x64xf32>
    %323 = vector.shape_cast %322 : vector<1x1x64xf32> to vector<1x64xf32>
    %324 = arith.addf %321, %323 : vector<1x64xf32>
    %cst_128 = arith.constant 0.000000e+00 : f32
    %325 = vector.broadcast %cst_128 : f32 to vector<1x64xf32>
    %326 = arith.maximumf %324, %325 : vector<1x64xf32>
    %327 = arith.truncf %326 : vector<1x64xf32> to vector<1x64xbf16>
    %c1_129 = arith.constant 1 : index
    %c0_130 = arith.constant 0 : index
    %c0_131 = arith.constant 0 : index
    %328 = vector.load %arg12[%c1_129, %c0_130, %c0_131] : memref<2x64x32xbf16, #tpu.memory_space<vmem>>, vector<1x64x32xbf16>
    %329 = vector.shape_cast %328 : vector<1x64x32xbf16> to vector<64x32xbf16>
    %cst_132 = arith.constant dense<0.000000e+00> : vector<1x32xf32>
    %330 = tpu.matmul %327, %329, %cst_132 {dimension_numbers = #tpu.dot_dimension_numbers<[1], [0], [0], [1], [0, 0, 1, 1], [], []>} : vector<1x64xbf16>, vector<64x32xbf16>, vector<1x32xf32> -> vector<1x32xf32>
    %c1_133 = arith.constant 1 : index
    %c0_134 = arith.constant 0 : index
    %c0_135 = arith.constant 0 : index
    %331 = vector.load %arg13[%c1_133, %c0_134, %c0_135] : memref<2x1x32xf32, #tpu.memory_space<vmem>>, vector<1x1x32xf32>
    %332 = vector.shape_cast %331 : vector<1x1x32xf32> to vector<1x32xf32>
    %333 = arith.addf %330, %332 : vector<1x32xf32>
    %334 = arith.addf %317, %333 : vector<1x32xf32>
    %c1_136 = arith.constant 1 : index
    %c0_137 = arith.constant 0 : index
    %c0_138 = arith.constant 0 : index
    %335 = vector.load %arg14[%c1_136, %c0_137, %c0_138] : memref<2x1x32xf32, #tpu.memory_space<vmem>>, vector<1x1x32xf32>
    %336 = vector.shape_cast %335 : vector<1x1x32xf32> to vector<1x32xf32>
    %c1_139 = arith.constant 1 : index
    %c0_140 = arith.constant 0 : index
    %c0_141 = arith.constant 0 : index
    %337 = vector.load %arg15[%c1_139, %c0_140, %c0_141] : memref<2x1x32xf32, #tpu.memory_space<vmem>>, vector<1x1x32xf32>
    %338 = vector.shape_cast %337 : vector<1x1x32xf32> to vector<1x32xf32>
    %cst_142 = arith.constant dense<0.000000e+00> : vector<1xf32>
    %339 = vector.multi_reduction <add>, %334, %cst_142 [1] : vector<1x32xf32> to vector<1xf32>
    %340 = vector.shape_cast %339 : vector<1xf32> to vector<1x1xf32>
    %cst_143 = arith.constant 3.200000e+01 : f32
    %341 = vector.broadcast %cst_143 : f32 to vector<1x1xf32>
    %342 = arith.divf %340, %341 : vector<1x1xf32>
    %343 = vector.broadcast %342 : vector<1x1xf32> to vector<1x32xf32>
    %344 = arith.subf %334, %343 : vector<1x32xf32>
    %345 = arith.mulf %344, %344 : vector<1x32xf32>
    %cst_144 = arith.constant dense<0.000000e+00> : vector<1xf32>
    %346 = vector.multi_reduction <add>, %345, %cst_144 [1] : vector<1x32xf32> to vector<1xf32>
    %347 = vector.shape_cast %346 : vector<1xf32> to vector<1x1xf32>
    %cst_145 = arith.constant 3.200000e+01 : f32
    %348 = vector.broadcast %cst_145 : f32 to vector<1x1xf32>
    %349 = arith.divf %347, %348 : vector<1x1xf32>
    %350 = vector.broadcast %342 : vector<1x1xf32> to vector<1x32xf32>
    %351 = arith.subf %334, %350 : vector<1x32xf32>
    %cst_146 = arith.constant 9.99999974E-6 : f32
    %352 = vector.broadcast %cst_146 : f32 to vector<1x1xf32>
    %353 = arith.addf %349, %352 : vector<1x1xf32>
    %354 = math.rsqrt %353 : vector<1x1xf32>
    %355 = vector.broadcast %354 : vector<1x1xf32> to vector<1x32xf32>
    %356 = arith.mulf %351, %355 : vector<1x32xf32>
    %357 = arith.mulf %356, %336 : vector<1x32xf32>
    %358 = arith.addf %357, %338 : vector<1x32xf32>
    %359 = vector.shape_cast %358 : vector<1x32xf32> to vector<1x1x32xf32>
    %c0_147 = arith.constant 0 : index
    %c0_148 = arith.constant 0 : index
    %c0_149 = arith.constant 0 : index
    %360 = vector.load %arg16[%c0_147, %c0_148, %c0_149] : memref<1x1x32xf32, #tpu.memory_space<vmem>>, vector<1x1x32xf32>
    tpu.vector_store %arg16[%c0_147, %c0_148, %c0_149], %359 {strides = array<i32>} : memref<1x1x32xf32, #tpu.memory_space<vmem>>, vector<1x1x32xf32>,
    return
  }
  func.func @transform_0(%arg0: i32) -> (i32, i32, i32) {
    %c0_i32 = arith.constant 0 : i32
    %c0_i32_0 = arith.constant 0 : i32
    %c0_i32_1 = arith.constant 0 : i32
    return %arg0, %c0_i32, %c0_i32_0 : i32, i32, i32
  }
  func.func @transform_1(%arg0: i32) -> (i32, i32) {
    %c0_i32 = arith.constant 0 : i32
    %c0_i32_0 = arith.constant 0 : i32
    %c0_i32_1 = arith.constant 0 : i32
    return %c0_i32, %c0_i32_0 : i32, i32
  }
  func.func @transform_2(%arg0: i32) -> (i32, i32, i32) {
    %c0_i32 = arith.constant 0 : i32
    %c0_i32_0 = arith.constant 0 : i32
    %c0_i32_1 = arith.constant 0 : i32
    return %arg0, %c0_i32, %c0_i32_0 : i32, i32, i32
  }
  func.func @transform_3(%arg0: i32) -> (i32, i32, i32) {
    %c0_i32 = arith.constant 0 : i32
    %c0_i32_0 = arith.constant 0 : i32
    %c0_i32_1 = arith.constant 0 : i32
    %c0_i32_2 = arith.constant 0 : i32
    return %c0_i32, %c0_i32_0, %c0_i32_1 : i32, i32, i32
  }
  func.func @transform_4(%arg0: i32) -> (i32, i32, i32) {
    %c0_i32 = arith.constant 0 : i32
    %c0_i32_0 = arith.constant 0 : i32
    %c0_i32_1 = arith.constant 0 : i32
    %c0_i32_2 = arith.constant 0 : i32
    return %c0_i32, %c0_i32_0, %c0_i32_1 : i32, i32, i32
  }
  func.func @transform_5(%arg0: i32) -> (i32, i32, i32) {
    %c0_i32 = arith.constant 0 : i32
    %c0_i32_0 = arith.constant 0 : i32
    %c0_i32_1 = arith.constant 0 : i32
    %c0_i32_2 = arith.constant 0 : i32
    return %c0_i32, %c0_i32_0, %c0_i32_1 : i32, i32, i32
  }
  func.func @transform_6(%arg0: i32) -> (i32, i32, i32) {
    %c0_i32 = arith.constant 0 : i32
    %c0_i32_0 = arith.constant 0 : i32
    %c0_i32_1 = arith.constant 0 : i32
    %c0_i32_2 = arith.constant 0 : i32
    return %c0_i32, %c0_i32_0, %c0_i32_1 : i32, i32, i32
  }
  func.func @transform_7(%arg0: i32) -> (i32, i32, i32) {
    %c0_i32 = arith.constant 0 : i32
    %c0_i32_0 = arith.constant 0 : i32
    %c0_i32_1 = arith.constant 0 : i32
    %c0_i32_2 = arith.constant 0 : i32
    return %c0_i32, %c0_i32_0, %c0_i32_1 : i32, i32, i32
  }
  func.func @transform_8(%arg0: i32) -> (i32, i32, i32) {
    %c0_i32 = arith.constant 0 : i32
    %c0_i32_0 = arith.constant 0 : i32
    %c0_i32_1 = arith.constant 0 : i32
    %c0_i32_2 = arith.constant 0 : i32
    return %c0_i32, %c0_i32_0, %c0_i32_1 : i32, i32, i32
  }
  func.func @transform_9(%arg0: i32) -> (i32, i32, i32) {
    %c0_i32 = arith.constant 0 : i32
    %c0_i32_0 = arith.constant 0 : i32
    %c0_i32_1 = arith.constant 0 : i32
    %c0_i32_2 = arith.constant 0 : i32
    return %c0_i32, %c0_i32_0, %c0_i32_1 : i32, i32, i32
  }
  func.func @transform_10(%arg0: i32) -> (i32, i32, i32) {
    %c0_i32 = arith.constant 0 : i32
    %c0_i32_0 = arith.constant 0 : i32
    %c0_i32_1 = arith.constant 0 : i32
    %c0_i32_2 = arith.constant 0 : i32
    return %c0_i32, %c0_i32_0, %c0_i32_1 : i32, i32, i32
  }
  func.func @transform_11(%arg0: i32) -> (i32, i32, i32) {
    %c0_i32 = arith.constant 0 : i32
    %c0_i32_0 = arith.constant 0 : i32
    %c0_i32_1 = arith.constant 0 : i32
    %c0_i32_2 = arith.constant 0 : i32
    return %c0_i32, %c0_i32_0, %c0_i32_1 : i32, i32, i32
  }
  func.func @transform_12(%arg0: i32) -> (i32, i32, i32) {
    %c0_i32 = arith.constant 0 : i32
    %c0_i32_0 = arith.constant 0 : i32
    %c0_i32_1 = arith.constant 0 : i32
    %c0_i32_2 = arith.constant 0 : i32
    return %c0_i32, %c0_i32_0, %c0_i32_1 : i32, i32, i32
  }
  func.func @transform_13(%arg0: i32) -> (i32, i32, i32) {
    %c0_i32 = arith.constant 0 : i32
    %c0_i32_0 = arith.constant 0 : i32
    %c0_i32_1 = arith.constant 0 : i32
    %c0_i32_2 = arith.constant 0 : i32
    return %c0_i32, %c0_i32_0, %c0_i32_1 : i32, i32, i32
  }
  func.func @transform_14(%arg0: i32) -> (i32, i32, i32) {
    %c0_i32 = arith.constant 0 : i32
    %c0_i32_0 = arith.constant 0 : i32
    %c0_i32_1 = arith.constant 0 : i32
    %c0_i32_2 = arith.constant 0 : i32
    return %c0_i32, %c0_i32_0, %c0_i32_1 : i32, i32, i32
  }
  func.func @transform_15(%arg0: i32) -> (i32, i32, i32) {
    %c0_i32 = arith.constant 0 : i32
    %c0_i32_0 = arith.constant 0 : i32
    %c0_i32_1 = arith.constant 0 : i32
    return %arg0, %c0_i32, %c0_i32_0 : i32, i32, i32
  }
}

</mosaic_0001>

<bundles_post_ra>
// kernel: tpu_custom_call.1
= control target key start
LH: loop header
LB: loop body
LE: loop exit
PB: predicated region body
PF: predicated region fallthrough
CT: control target
= control target key end

     0   :  { %s3426_s0 = inlined_call_operand.hbm [shape: f32[2,8,32], index: 0, kind: input, shape index: {}]   ;;  %s3427_s1 = inlined_call_operand.hbm [shape: f32[8,32], index: 1, kind: input, shape index: {}]   ;;  %s3428_s2 = inlined_call_operand.vmem [shape: f32[2,1,8], index: 2, kind: input, shape index: {}]   ;;  %s3429_s3 = inlined_call_operand.vmem [shape: bf16[2,32,96], index: 3, kind: input, shape index: {}]   ;;  %s3430_s4 = inlined_call_operand.vmem [shape: f32[2,1,96], index: 4, kind: input, shape index: {}]   ;;  %s3431_s5 = inlined_call_operand.vmem [shape: bf16[2,32,32], index: 5, kind: input, shape index: {}]   ;;  %s3432_s6 = inlined_call_operand.vmem [shape: f32[2,1,32], index: 6, kind: input, shape index: {}]   ;;  %s3433_s7 = inlined_call_operand.vmem [shape: f32[2,1,32], index: 7, kind: input, shape index: {}]   ;;  %s3434_s8 = inlined_call_operand.vmem [shape: f32[2,1,32], index: 8, kind: input, shape index: {}]   ;;  %s3435_s9 = inlined_call_operand.vmem [shape: bf16[2,32,64], index: 9, kind: input, shape index: {}]   ;;  %s3436_s10 = inlined_call_operand.vmem [shape: f32[2,1,64], index: 10, kind: input, shape index: {}]   ;;  %s3437_s11 = inlined_call_operand.vmem [shape: bf16[2,64,32], index: 11, kind: input, shape index: {}]   ;;  %s3438_s12 = inlined_call_operand.vmem [shape: f32[2,1,32], index: 12, kind: input, shape index: {}]   ;;  %s3439_s13 = inlined_call_operand.vmem [shape: f32[2,1,32], index: 13, kind: input, shape index: {}]   ;;  %s3440_s14 = inlined_call_operand.vmem [shape: f32[2,1,32], index: 14, kind: input, shape index: {}]   ;;  %s3441_s15 = inlined_call_operand.hbm [shape: f32[2,1,32], index: 15, kind: output, shape index: {}]  }
   0x1   :  { %3463 = sst [smem:[#allocation18_spill]] %s3427_s1 }
   0x2   :  { %3464 = sst [smem:[#allocation19_spill]] %s3440_s14 }
   0x3   :  { %3465 = sst [smem:[#allocation20_spill]] %s3441_s15 }
   0x4   :  { %20 = vsyncpa [#allocation3], 0 }
   0x5   :  { %22 = vsyncpa [#allocation3 + $0x1], 0 }
   0x6   :  { %23 = vsyncpa [#allocation6], 0 }
   0x7   :  { %24 = vsyncpa [#allocation4], 0 }
   0x8   :  { %26 = vsyncpa [#allocation4 + $0x1], 0  ;;  %s2918_s18 = smov 0   ;;  %s2920_s19 = smov 0  }
   0x9   :  { %s2922_s20 = smov 0   ;;  %s2924_s21 = smov 0  }
   0xa LB: > { %3466 = sst [smem:[#allocation11_spill]] %s2805_s18  ;;  %s2939_s22 = sadd.s32 4294967295, %s2817_s21   ;;  %s2817_s21 = sphi %s2924_s21, %s3503_s21   ;;  %s2813_s20 = sphi %s2922_s20, %s3505_s20   ;;  %s2809_s19 = sphi %s2920_s19, %s3507_s19   ;;  %s2805_s18 = sphi %s2918_s18, %s3506_s18  }
   0xb   : > { %3467 = sst [smem:[#allocation12_spill]] %s2813_s20  ;;  %s2241_s23 = sadd.s32 4294967294, %s2817_s21  }
   0xc   : > { %3468 = sst [smem:[#allocation13_spill]] %s2817_s21  ;;  %p52_p0 = scmp.ne.s32.totalorder %s2809_s19, %s2805_s18 }
   0xd   : > { %p3442_p1 = scmp.eq.s32.totalorder %s2939_s22, 0  ;;  %p381_p3 = scmp.eq.s32.totalorder %s2241_s23, 1 }
   0xe   : > { %p2242_p5 = scmp.ge.s32.totalorder %s2817_s21, 1  ;;  %p388_p7 = scmp.lt.s32.totalorder %s2817_s21, 3 }
   0xf   : > { %p2948_p4 = por %p3442_p1, %p52_p0  ;;  %p2953_p6 = por %p381_p3, %p52_p0 }
  0x10   : > { %p2958_p8 = pnand %p2242_p5, %p388_p7  ;;  %s2819_s27 = smov [#allocation5]  }
  0x11   : > { %s3469_s24 = scalar_select %p2948_p4, 1, 0 }
  0x12   : > { %s3470_s25 = scalar_select %p2953_p6, 1, 0 }
  0x13   : > { %s3472_s26 = scalar_select %p2958_p8, 1, 0 }
  0x14   : > { %3471 = sst [smem:[#allocation14_spill]] %s3470_s25  ;;  %s401_s28 = sshll.u32 %s2819_s27, 4  ;;  %s402_s28 = int_to_ptr.vmem [resolvable:$true] %s401_s28 }
  0x15   : > { %p2570_p10 = pneg %p2958_p8  ;;  %s2966_s29 = sadd.s32 1, %s2817_s21  }
  0x16   : > { %3473 = sst [smem:[#allocation15_spill]] %s2966_s29  ;;  %s36_s16 = ssub.s32 %s2817_s21, %s2966_s29 }
  0x17   : > { %p2970_p11 = pnand %p2570_p10, %p3442_p1  ;;  %p2976_p12 = scmp.eq.s32.totalorder %s36_s16, 0 }
  0x18   : > { %s39_s23 = sadd.s32 1, %s2813_s20  ;;  %p46_p13 = scmp.ne.s32.totalorder %s2813_s20, %s2809_s19 }
  0x19   : > { %p2697_p0 = pneg %p2970_p11  ;;  %s2706_s27 = scalar_lea.vmem %s402_s28, 128 }
  0x1a   : > { %p2707_p3 = scmp.ne.s32.totalorder %s402_s28, %s2706_s27  ;;  %p2714_p9 = scmp.lt.s32.totalorder %s402_s28, %s402_s28 }
  0x1b   : > { %p2715_p2 = scmp.lt.s32.totalorder %s2706_s27, %s2706_s27 }
  0x1c   : > { %p2709_p5 = pnand %p2707_p3, %p2697_p0 }
  0x1d   : > { %p2716_p10 = por %p2715_p2, %p2714_p9 }
  0x1e   : > { %p2710_p7 = pneg %p2709_p5 }
  0x20   : > { %p2717_p1 = pnand %p2716_p10, %p2710_p7 }
  0x22   : > { %2720 = shalt.err (!%p2717_p1)
}
  0x23   : > { %s3476_s1 = sld [smem:[#allocation18_spill]]  ;;  %p47_p1 = scmp.eq.s32.totalorder %s2817_s21, 0 }
  0x24   : > { %s2993_s27 = scalar_select %p2976_p12, %s2813_s20, %s39_s23  }
  0x25   : > { %p3478_p2 = scmp.eq.s32.totalorder %s2939_s22, 1  ;;  %p2583_p0 = scmp.lt.s32.totalorder %s2817_s21, 2 }
  0x26   : > { %3477 = sst [smem:[#allocation16_spill]] %s2993_s27  ;;  %s448_s30 = sand.u32 1, %s2813_s20  }
  0x27   : > { %p3001_p9 = por %p3478_p2, %p46_p13  ;;  %p48_p3 = por %p47_p1, %p46_p13 }
  0x28   : > { %s2245_s16 = sshll.u32 %s448_s30, 3  ;;  %s2246_s25 = sshll.u32 %s2817_s21, 7 }
  0x29   : > { %2573 = dma.hbm_to_vmem [thread:$0]  (!%p2970_p11), %s3476_s1, 128, %s402_s28, [#allocation6]  }
  0x2a   : > { %s3479_s29 = scalar_select %p3001_p9, 1, 0 }
  0x2b   : > { %s3014_s28 = scalar_lea.hbm %s3426_s0, %s2246_s25  ;;  %s452_s17 = scalar_lea.vmem [#allocation2], %s2245_s16 }
  0x2c   : > { %3480 = sst [smem:[#allocation17_spill]] %s3479_s29  ;;  %s459_s23 = sshll.u32 %s452_s17, 4  ;;  %s460_s23 = int_to_ptr.vmem [resolvable:$true] %s459_s23 }
  0x2d   : > { %p3016_p11 = pnand %p2583_p0, %p48_p3  ;;  %s449_s27 = scalar_lea.sflag [#allocation3], %s448_s30 }
  0x2e   : > { %s2721_s20 = scalar_lea.hbm %s3014_s28, 128  ;;  %s2726_s25 = scalar_lea.hbm %s3426_s0, 256 }
  0x2f   : > { %p2722_p12 = scmp.ne.s32.totalorder %s3014_s28, %s2721_s20  ;;  %p2723_p13 = pneg %p3016_p11 }
  0x30   : > { %p2727_p10 = scmp.lt.s32.totalorder %s3014_s28, %s3426_s0  ;;  %p2728_p1 = scmp.lt.s32.totalorder %s2726_s25, %s2721_s20 }
  0x31   : > { %p2724_p5 = pnand %p2723_p13, %p2722_p12 }
  0x32   : > { %p2729_p2 = por %p2728_p1, %p2727_p10 }
  0x33   : > { %p2725_p7 = pneg %p2724_p5 }
  0x35   : > { %p2730_p0 = pnand %p2729_p2, %p2725_p7 }
  0x37   : > { %2733 = shalt.err (!%p2730_p0)
}
  0x38   : > { %s2734_s17 = scalar_lea.vmem %s460_s23, 128  ;;  %s2820_s30 = smov [#allocation2]  }
  0x39   : > { %p2735_p3 = scmp.ne.s32.totalorder %s460_s23, %s2734_s17  ;;  %s2739_s29 = sshll.u32 %s2820_s30, 4  ;;  %s2740_s29 = int_to_ptr.vmem [resolvable:$false] %s2739_s29 }
  0x3a   : > { %s2741_s14 = scalar_lea.vmem %s2740_s29, 256  ;;  %p2742_p12 = scmp.lt.s32.totalorder %s460_s23, %s2740_s29 }
  0x3b   : > { %p2737_p6 = pnand %p2735_p3, %p2723_p13  ;;  %p2743_p5 = scmp.lt.s32.totalorder %s2741_s14, %s2734_s17 }
  0x3d   : > { %p2738_p9 = pneg %p2737_p6  ;;  %p2744_p4 = por %p2743_p5, %p2742_p12 }
  0x3f   : > { %p2745_p8 = pnand %p2744_p4, %p2738_p9 }
  0x41   : > { %2748 = shalt.err (!%p2745_p8)
}
  0x42   : > { %2577 = dma.hbm_to_vmem [thread:$0]  (!%p3016_p11), %s3014_s28, 128, %s460_s23, %s449_s27  }
  0x43   : > { %p3482_p7 = scmp.ne.s32.totalorder %s3472_s26, 0 }
  0x44   : > { %s3037_s20 = sand.u32 (!%p3482_p7), 1, %s2809_s19   ;;  %p3483_p6 = scmp.ne.s32.totalorder (!%p3482_p7), %s3469_s24, 0 }
  0x45   : > { %474 = sbr.rel (%p3482_p7) target bundleno = 4931 (0x1343), region = 80  ;;  %s2248_s21 = sshll.u32 (!%p3482_p7), %s3037_s20, 3 }
  0x46   : > { %s477_s15 = scalar_lea.sflag (!%p3482_p7), [#allocation3], %s3037_s20  ;;  %s480_s29 = scalar_lea.vmem (!%p3482_p7), [#allocation2], %s2248_s21 }
  0x4a   : > { %2792 = dma.done.wait (%p3483_p6), %s477_s15, 128  }
  0x4b   : > { %2794 = vsyncadd (%p3483_p6), %s477_s15, 4294967168  ;;  %p3484_p4 = scmp.eq.s32.totalorder %s2939_s22, 0 }
  0x4d   : > { %2796 = dma.done.wait (%p3484_p4), [#allocation6], 128   ;;  %p3485_p8 = pmov %p3484_p4 }
  0x4e   : > { %v2821_v0 = vmov 0.0   ;;  %vm2822_vm0 = vmmov 0   ;;  %v2635_v1 = vld [vmem:[%s3429_s3 + $0x8] sm:$0xff]   ;;  %v2636_v2 = vld [vmem:[%s3429_s3] sm:$0xff]   ;;  %v538_v4 = vld [vmem:[#allocation5] sm:$0xff]  ;;  %vm565_vm1 = vcmask 261120   ;;  %v667_v25 = vlaneseq }
  0x4f   : > { %2798 = vsyncadd (%p3485_p8), [#allocation6], 4294967168  ;;  %2394 = vmatprep.subr.bf16.mxu1 %v2821_v0  ;;  %2398 = vmatprep.mubr.msk.bf16.mxu1 %vm2822_vm0, %v2821_v0  ;;  %v537_v3 = vld [vmem:[%s480_s29] sm:$0xff]  ;;  %s2823_s23 = smov 120   ;;  %s2824_s18 = smov 96   ;;  %vm618_vm2 = vcmask 64512  }
  0x50   : > { %2408 = vmatprep.subr.bf16.mxu0 %v2821_v0  ;;  %2410 = vmatprep.mubr.msk.bf16.mxu0 %vm2822_vm0, %v2821_v0  ;;  %v3062_v5 = vadd.f32 %v538_v4, %v537_v3  ;;  %v2250_v7 = vld [vmem:[%s3430_s4] ss:$0 sm:$0xff]  ;;  %s2825_s25 = smov 80   ;;  %s2826_s16 = smov 88   ;;  %v668_v26 = vshrl.u32 %v667_v25, 7  ;;  %vm690_vm3 = vcmask 1043456  }
  0x51   : > { %2395 = vmatpush3.bf16.msra.mxu1 %v2635_v1  ;;  %s2827_s17 = smov 72   ;;  %s2828_s30 = smov 112   ;;  %vm1083_vm4 = vcmask 130048   ;;  %vm1085_vm5 = vcmask 195584   ;;  %vm1288_vm6 = vcmask 523264   ;;  %vm1490_vm7 = vcmask 57344  }
  0x52   : > { %2396 = vmatprep.subr.bf16.mxu1 %v2821_v0  ;;  %v541_v6 = vpack.c.bf16 %v3062_v5, %v3062_v5  ;;  %s2829_s21 = smov 104   ;;  %p533_p9 = scmp.lt.s32.totalorder %s2939_s22, 1  ;;  %v669_v27 = vsub.s32 0, %v668_v26  ;;  %vm1963_vm8 = vcmask 253952  }
  0x53   : > { %s3462_s24 = smov 56   ;;  %s3461_s26 = smov 64  }
  0x54   : > { %s534_s15 = scalar_select %p533_p9, %s2939_s22, 1 }
  0x55   : > { %2397 = vmatpush3.bf16.msra.mxu1 %v2636_v2  ;;  %s3457_s27 = smov 40   ;;  %s3456_s28 = smov 48  }
  0x56   : > { %2402 = vmatprep.subr.bf16.mxu1 %v2821_v0  ;;  %s535_s14 = scalar_lea.vmem %s3428_s2, %s534_s15  ;;  %s3460_s15 = smov 8  }
  0x57   : > { %v3115_v28 = vld [vmem:[%s535_s14] sm:$0x1]  ;;  %s3458_s29 = smov 24   ;;  %s3492_s14 = smov 16  }
  0x58   : > { %2399 = vmatmul.mubr.msk.bf16.vlgmr.msra.gmra.mxu1 %vm565_vm1, %v541_v6  ;;  %v670_v29 = vrot.slane %v3115_v28, %v669_v27  ;;  %s2837_s1 = smov [#allocation7]  }
  0x59   : > { %2404 = vmatprep.mubr.msk.bf16.mxu1 %vm2822_vm0, %v2821_v0 }
 0x118   : > { %v603_v8 = vpop.f32.mrf.mxu1 }
 0x119   : > { %v604_v9 = vadd.f32 %v2250_v7, %v603_v8 }
 0x11a   : > { %v2400_v10 = vpop.f32.mrf.mxu1 }
 0x11b   : > { %v3073_v11 = vpack.c.bf16 %v604_v9, %v604_v9 }
 0x11c   : > { %v606_v12 = vpop.f32.mrf.mxu1 }
 0x11d   : > { %734 = vrot.lane.b32.xlu1 %v3073_v11, %s2823_s23  ;;  %616 = vrot.lane.b32.xlu0 %v3073_v11, %s2824_s18 }
 0x11e   : > { %v2401_v13 = vpop.f32.mrf.mxu1 }
 0x121   : > { %848 = vrot.lane.b32.xlu1 %v3073_v11, %s2825_s25  ;;  %736 = vrot.lane.b32.xlu0 %v3073_v11, %s2826_s16 }
 0x125   : > { %960 = vrot.lane.b32.xlu1 %v3073_v11, %s2827_s17  ;;  %846 = vrot.lane.b32.xlu0 %v3073_v11, %s2828_s30 }
 0x129   : > { %958 = vrot.lane.b32.xlu0 %v3073_v11, %s2829_s21 }
 0x18f   : > { %v617_v14 = vpop.permute.xlu0 %616  ;;  %v735_v17 = vpop.permute.xlu1 %734 }
 0x190   : > { %v623_v15 = vsel %vm618_vm2, %v617_v14, 0 }
 0x191   : > { %2403 = vmatpush3.bf16.xpose.msra.mxu1 %v623_v15 }
 0x192   : > { %2414 = vmatprep.subr.bf16.mxu1 %v2821_v0 }
 0x193   : > { %v737_v16 = vpop.permute.xlu0 %736  ;;  %v849_v19 = vpop.permute.xlu1 %848 }
 0x194   : > { %v742_v18 = vsel %vm618_vm2, %v737_v16, 0  ;;  %v854_v20 = vsel %vm618_vm2, %v849_v19, 0 }
 0x197   : > { %v961_v21 = vpop.permute.xlu1 %960  ;;  %v847_v22 = vpop.permute.xlu0 %846 }
 0x198   : > { %2405 = vmatmul.mubr.msk.bf16.vlgmr.msra.gmra.mxu1 %vm618_vm2, %v3073_v11  ;;  %v966_v23 = vsel %vm618_vm2, %v961_v21, 0 }
 0x199   : > { %2415 = vmatpush3.bf16.xpose.msra.mxu1 %v742_v18  ;;  %2416 = vmatprep.mubr.msk.bf16.mxu1 %vm2822_vm0, %v2821_v0 }
 0x19a   : > { %2426 = vmatprep.subr.bf16.mxu1 %v2821_v0 }
 0x19b   : > { %v959_v24 = vpop.permute.xlu0 %958 }
 0x1a0   : > { %2417 = vmatmul.mubr.msk.bf16.vlgmr.msra.gmra.mxu1 %vm618_vm2, %v735_v17 }
 0x1a1   : > { %2427 = vmatpush3.bf16.xpose.msra.mxu1 %v854_v20  ;;  %2428 = vmatprep.mubr.msk.bf16.mxu1 %vm2822_vm0, %v2821_v0 }
 0x1a2   : > { %2438 = vmatprep.subr.bf16.mxu1 %v2821_v0 }
 0x1a8   : > { %2429 = vmatmul.mubr.msk.bf16.vlgmr.msra.gmra.mxu1 %vm618_vm2, %v847_v22 }
 0x1a9   : > { %2439 = vmatpush3.bf16.xpose.msra.mxu1 %v966_v23  ;;  %2440 = vmatprep.mubr.msk.bf16.mxu1 %vm2822_vm0, %v2821_v0 }
 0x1aa   : > { %2450 = vmatprep.subr.bf16.mxu1 %v2821_v0 }
 0x1b0   : > { %2441 = vmatmul.mubr.msk.bf16.vlgmr.msra.gmra.mxu1 %vm618_vm2, %v959_v24 }
 0x1b1   : > { %2454 = vmatprep.mubr.msk.bf16.mxu1 %vm2822_vm0, %v2821_v0 }
 0x258   : > { %v659_v30 = vpop.f32.mrf.mxu1 }
 0x259   : > { %v665_v31 = vmul.f32 0.35355338, %v659_v30 }
 0x25a   : > { %v2406_v32 = vpop.f32.mrf.mxu1 }
 0x25b   : > { %v672_v33 = vadd.f32 %v670_v29, %v665_v31 }
 0x25c   : > { %v662_v34 = vpop.f32.mrf.mxu1 }
 0x25d   : > { %v673_v35 = vsel %vm618_vm2, %v672_v33, -inf }
 0x25e   : > { %674 = vmax.xlane.f32.xlu1 %v673_v35  ;;  %v2407_v36 = vpop.f32.mrf.mxu1 }
 0x260   : > { %v778_v37 = vpop.f32.mrf.mxu1 }
 0x261   : > { %v784_v38 = vmul.f32 0.35355338, %v778_v37 }
 0x262   : > { %v2418_v39 = vpop.f32.mrf.mxu1 }
 0x263   : > { %v785_v40 = vadd.f32 %v784_v38, %v670_v29 }
 0x264   : > { %v781_v41 = vpop.f32.mrf.mxu1 }
 0x265   : > { %v786_v42 = vsel %vm618_vm2, %v785_v40, -inf }
 0x266   : > { %787 = vmax.xlane.f32.xlu0 %v786_v42  ;;  %v2419_v43 = vpop.f32.mrf.mxu1 }
 0x268   : > { %v890_v44 = vpop.f32.mrf.mxu1 }
 0x269   : > { %v896_v45 = vmul.f32 0.35355338, %v890_v44 }
 0x26a   : > { %v2430_v46 = vpop.f32.mrf.mxu1 }
 0x26b   : > { %v897_v47 = vadd.f32 %v896_v45, %v670_v29 }
 0x26c   : > { %v893_v48 = vpop.f32.mrf.mxu1 }
 0x26d   : > { %v898_v49 = vsel %vm618_vm2, %v897_v47, -inf }
 0x26e   : > { %899 = vmax.xlane.f32.xlu0 %v898_v49  ;;  %v2431_v50 = vpop.f32.mrf.mxu1  ;;  %v2637_v49 = vld [vmem:[%s3431_s5 + $0x8] sm:$0xff]  }
 0x26f   : > { %2451 = vmatpush3.bf16.msra.mxu1 %v2637_v49  ;;  %v2638_v50 = vld [vmem:[%s3431_s5] sm:$0xff]  }
 0x270   : > { %v1002_v51 = vpop.f32.mrf.mxu1  ;;  %2452 = vmatprep.subr.bf16.mxu1 %v2821_v0 }
 0x271   : > { %v1008_v52 = vmul.f32 0.35355338, %v1002_v51 }
 0x272   : > { %v2442_v53 = vpop.f32.mrf.mxu1 }
 0x273   : > { %v1009_v54 = vadd.f32 %v1008_v52, %v670_v29  ;;  %2453 = vmatpush3.bf16.msra.mxu1 %v2638_v50 }
 0x274   : > { %v1005_v55 = vpop.f32.mrf.mxu1  ;;  %2466 = vmatprep.subr.bf16.mxu1 %v2821_v0 }
 0x275   : > { %v1010_v56 = vsel %vm618_vm2, %v1009_v54, -inf }
 0x276   : > { %1011 = vmax.xlane.f32.xlu1 %v1010_v56  ;;  %v2443_v57 = vpop.f32.mrf.mxu1 }
 0x2e7   : > { %v675_v58 = vpop.xlane.xlu1 %674 }
 0x2e8   : > { %v676_v59 = vsub.f32 %v672_v33, %v675_v58 }
 0x2ea   : > { %v677_v60 = vmul.f32 1.442695, %v676_v59 }
 0x2ec   : > { %2655 = vpow2.f32 %v677_v60 }
 0x2ef   : > { %v788_v61 = vpop.xlane.xlu0 %787 }
 0x2f0   : > { %v789_v62 = vsub.f32 %v785_v40, %v788_v61 }
 0x2f2   : > { %v790_v63 = vmul.f32 1.442695, %v789_v62 }
 0x2f4   : > { %2657 = vpow2.f32 %v790_v63 }
 0x2f7   : > { %v900_v1 = vpop.xlane.xlu0 %899 }
 0x2f8   : > { %v901_v2 = vsub.f32 %v897_v47, %v900_v1 }
 0x2f9   : > { %v2656_v3 = vpop.eup %2655 }
 0x2fa   : > { %v902_v4 = vmul.f32 1.442695, %v901_v2  ;;  %v679_v6 = vsel %vm618_vm2, %v2656_v3, 0.0 }
 0x2fb   : > { %680 = vadd.xlane.f32.xlu0 %v679_v6 }
 0x2fc   : > { %2659 = vpow2.f32 %v902_v4 }
 0x2ff   : > { %v1012_v12 = vpop.xlane.xlu1 %1011 }
 0x300   : > { %v1013_v13 = vsub.f32 %v1009_v54, %v1012_v12 }
 0x301   : > { %v2658_v7 = vpop.eup %2657 }
 0x302   : > { %v792_v8 = vsel %vm618_vm2, %v2658_v7, 0.0  ;;  %v1014_v14 = vmul.f32 1.442695, %v1013_v13 }
 0x303   : > { %793 = vadd.xlane.f32.xlu1 %v792_v8 }
 0x304   : > { %2661 = vpow2.f32 %v1014_v14 }
 0x309   : > { %v2660_v9 = vpop.eup %2659 }
 0x30a   : > { %v904_v10 = vsel %vm618_vm2, %v2660_v9, 0.0 }
 0x30b   : > { %905 = vadd.xlane.f32.xlu0 %v904_v10 }
 0x311   : > { %v2662_v15 = vpop.eup %2661 }
 0x312   : > { %v1016_v16 = vsel %vm618_vm2, %v2662_v15, 0.0 }
 0x314   : > { %798 = vrot.lane.b32.xlu1 %v3073_v11, %s3462_s24  ;;  %s3486_s24 = sld [smem:[#allocation19_spill]] }
 0x321   : > { %685 = vrot.lane.b32.xlu0 %v3073_v11, %s3461_s26 }
 0x325   : > { %1022 = vrot.lane.b32.xlu0 %v3073_v11, %s3457_s27  ;;  %s3459_s27 = smov 16  }
 0x338   : > { %1017 = vadd.xlane.f32.xlu1 %v1016_v16 }
 0x349   : > { %910 = vrot.lane.b32.xlu1 %v3073_v11, %s3456_s28 }
 0x384   : > { %v681_v17 = vpop.xlane.xlu0 %680 }
 0x385   : > { %2663 = vrcp.f32 %v681_v17 }
 0x38c   : > { %v794_v18 = vpop.xlane.xlu1 %793 }
 0x38d   : > { %2665 = vrcp.f32 %v794_v18  ;;  %v2639_v18 = vld [vmem:[%s3435_s9 + $0x8] sm:$0xff]  }
 0x390   : > { %v799_v24 = vpop.permute.xlu1 %798 }
 0x391   : > { %v804_v27 = vsel %vm690_vm3, %v799_v24, 0 }
 0x392   : > { %v2664_v19 = vpop.eup %2663 }
 0x393   : > { %v683_v21 = vmul.f32 %v2664_v19, %v2656_v3  ;;  %v2262_v3 = vld [vmem:[%s3432_s6] ss:$0 sm:$0xff]  ;;  %v2641_v19 = vld [vmem:[%s3437_s11 + $0x18] sm:$0xff]  }
 0x394   : > { %v906_v20 = vpop.xlane.xlu0 %905 }
 0x395   : > { %v684_v25 = vpack.c.bf16 %v683_v21, %v683_v21  ;;  %2667 = vrcp.f32 %v906_v20  ;;  %v2642_v20 = vld [vmem:[%s3437_s11 + $0x10] sm:$0xff]  }
 0x398   : > { %v686_v22 = vpop.permute.xlu0 %685 }
 0x399   : > { %v692_v23 = vsel %vm690_vm3, %v686_v22, 0 }
 0x39a   : > { %2409 = vmatpush3.bf16.msra.mxu0 %v692_v23  ;;  %v2666_v26 = vpop.eup %2665 }
 0x39b   : > { %2420 = vmatprep.subr.bf16.mxu0 %v2821_v0  ;;  %v796_v11 = vmul.f32 %v2666_v26, %v2658_v7 }
 0x39c   : > { %v1023_v35 = vpop.permute.xlu0 %1022 }
 0x39d   : > { %2411 = vmatmul.mubr.msk.bf16.vlgmr.msra.gmra.mxu0 %vm618_vm2, %v684_v25  ;;  %v797_v29 = vpack.c.bf16 %v796_v11, %v796_v11  ;;  %v1028_v37 = vsel %vm690_vm3, %v1023_v35, 0  ;;  %v2266_v25 = vld [vmem:[%s3433_s7] ss:$0 sm:$0xff] }
 0x39e   : > { %2421 = vmatpush3.bf16.msra.mxu0 %v804_v27  ;;  %2422 = vmatprep.mubr.msk.bf16.mxu0 %vm2822_vm0, %v2821_v0  ;;  %v2267_v27 = vld [vmem:[%s3434_s8] ss:$0 sm:$0xff] }
 0x39f   : > { %2432 = vmatprep.subr.bf16.mxu0 %v2821_v0 }
 0x3a2   : > { %v2668_v30 = vpop.eup %2667 }
 0x3a3   : > { %v908_v32 = vmul.f32 %v2668_v30, %v2660_v9 }
 0x3a5   : > { %2423 = vmatmul.mubr.msk.bf16.vlgmr.msra.gmra.mxu0 %vm618_vm2, %v797_v29  ;;  %v909_v36 = vpack.c.bf16 %v908_v32, %v908_v32  ;;  %v2644_v32 = vld [vmem:[%s3437_s11] sm:$0xff]  }
 0x3a6   : > { %2434 = vmatprep.mubr.msk.bf16.mxu0 %vm2822_vm0, %v2821_v0 }
 0x3c1   : > { %v1018_v31 = vpop.xlane.xlu1 %1017 }
 0x3c2   : > { %2669 = vrcp.f32 %v1018_v31  ;;  %v2643_v31 = vld [vmem:[%s3437_s11 + $0x8] sm:$0xff]  }
 0x3c5   : > { %v911_v33 = vpop.permute.xlu1 %910 }
 0x3c6   : > { %v916_v34 = vsel %vm690_vm3, %v911_v33, 0  ;;  %v2268_v33 = vld [vmem:[%s3436_s10] ss:$0 sm:$0xff] }
 0x3c7   : > { %2433 = vmatpush3.bf16.msra.mxu0 %v916_v34 }
 0x3c8   : > { %2444 = vmatprep.subr.bf16.mxu0 %v2821_v0 }
 0x3ca   : > { %2435 = vmatmul.mubr.msk.bf16.vlgmr.msra.gmra.mxu0 %vm618_vm2, %v909_v36 }
 0x3cb   : > { %2445 = vmatpush3.bf16.msra.mxu0 %v1028_v37  ;;  %2446 = vmatprep.mubr.msk.bf16.mxu0 %vm2822_vm0, %v2821_v0 }
 0x3cc   : > { %2458 = vmatprep.subr.bf16.mxu0 %v2821_v0 }
 0x3cf   : > { %v2670_v38 = vpop.eup %2669 }
 0x3d0   : > { %v1020_v39 = vmul.f32 %v2670_v38, %v2662_v15 }
 0x3d2   : > { %v1021_v40 = vpack.c.bf16 %v1020_v39, %v1020_v39 }
 0x3d4   : > { %2447 = vmatmul.mubr.msk.bf16.vlgmr.msra.gmra.mxu0 %vm618_vm2, %v1021_v40 }
 0x3d5   : > { %2462 = vmatprep.mubr.msk.bf16.mxu0 %vm2822_vm0, %v2821_v0  ;;  %2459 = vmatpush3.bf16.msra.mxu0 %v2639_v18 }
 0x3d6   : > { %2460 = vmatprep.subr.bf16.mxu0 %v2821_v0 }
 0x45d   : > { %v728_v41 = vpop.f32.mrf.mxu0 }
 0x45f   : > { %v2412_v42 = vpop.f32.mrf.mxu0 }
 0x461   : > { %v731_v43 = vpop.f32.mrf.mxu0 }
 0x463   : > { %v2413_v44 = vpop.f32.mrf.mxu0 }
 0x465   : > { %v840_v45 = vpop.f32.mrf.mxu0 }
 0x466   : > { %1071 = vrot.lane.b32.xlu1 %v840_v45, %s3460_s15  ;;  %s532_s15 = scalar_lea.vmem [#allocation7], %s3037_s20 }
 0x467   : > { %v2424_v46 = vpop.f32.mrf.mxu0  ;;  %s2156_s26 = sshll.u32 %s532_s15, 4  ;;  %s2157_s26 = int_to_ptr.vmem [resolvable:$true] %s2156_s26 }
 0x469   : > { %v843_v47 = vpop.f32.mrf.mxu0 }
 0x46b   : > { %v2425_v48 = vpop.f32.mrf.mxu0 }
 0x48a   : > { %v952_v51 = vpop.f32.mrf.mxu0 }
 0x48b   : > { %1075 = vrot.lane.b32.xlu0 %v952_v51, %s3459_s27  ;;  %s3493_s27 = smov 24  }
 0x48c   : > { %v2436_v52 = vpop.f32.mrf.mxu0 }
 0x48e   : > { %v955_v53 = vpop.f32.mrf.mxu0 }
 0x490   : > { %v2437_v54 = vpop.f32.mrf.mxu0 }
 0x491   : > { %v2645_v54 = vld [vmem:[%s3429_s3 + $0x18] sm:$0xff]  }
 0x494   : > { %v1064_v55 = vpop.f32.mrf.mxu0 }
 0x495   : > { %1079 = vrot.lane.b32.xlu1 %v1064_v55, %s3458_s29  ;;  %v2646_v55 = vld [vmem:[%s3429_s3 + $0x10] sm:$0xff]   ;;  %s2753_s29 = sshll.u32 %s2837_s1, 4  ;;  %s2754_s29 = int_to_ptr.vmem [resolvable:$false] %s2753_s29 }
 0x496   : > { %v2448_v56 = vpop.f32.mrf.mxu0  ;;  %p2756_p2 = scmp.lt.s32.totalorder %s2157_s26, %s2754_s29 }
 0x498   : > { %v1067_v57 = vpop.f32.mrf.mxu0 }
 0x49a   : > { %v2449_v58 = vpop.f32.mrf.mxu0 }
 0x4d8   : > { %v1072_v59 = vpop.permute.xlu1 %1071 }
 0x4d9   : > { %v1082_v61 = vsel %vm618_vm2, %v728_v41, %v1072_v59  ;;  %v2272_v41 = vld [vmem:[%s3438_s12] ss:$0 sm:$0xff] }
 0x4fd   : > { %v1076_v60 = vpop.permute.xlu0 %1075 }
 0x4fe   : > { %v1084_v62 = vsel %vm1083_vm4, %v1082_v61, %v1076_v60  ;;  %v2278_v60 = vld [vmem:[%s3439_s13] ss:$0 sm:$0xff] }
 0x507   : > { %v1080_v63 = vpop.permute.xlu1 %1079 }
 0x508   : > { %v1086_v1 = vsel %vm1085_vm5, %v1084_v62, %v1080_v63  ;;  %v2279_v62 = vld [vmem:[%s3486_s24] ss:$0 sm:$0xff] }
 0x509   : > { %v1087_v2 = vpack.c.bf16 %v1086_v1, %v1086_v1 }
 0x50b   : > { %2455 = vmatmul.mubr.msk.bf16.vlgmr.msra.gmra.mxu1 %vm565_vm1, %v1087_v2 }
 0x50c   : > { %2474 = vmatprep.mubr.msk.bf16.mxu1 %vm2822_vm0, %v2821_v0  ;;  %2467 = vmatpush3.bf16.msra.mxu1 %v2641_v19 }
 0x50d   : > { %2468 = vmatprep.subr.bf16.mxu1 %v2821_v0 }
 0x510   : > { %2469 = vmatpush3.bf16.msra.mxu1 %v2642_v20 }
 0x511   : > { %2470 = vmatprep.subr.bf16.mxu1 %v2821_v0 }
 0x514   : > { %2471 = vmatpush3.bf16.msra.mxu1 %v2643_v31 }
 0x515   : > { %2472 = vmatprep.subr.bf16.mxu1 %v2821_v0 }
 0x518   : > { %2473 = vmatpush3.bf16.msra.mxu1 %v2644_v32 }
 0x519   : > { %2492 = vmatprep.subr.bf16.mxu1 %v2821_v0 }
 0x5cb   : > { %v1143_v4 = vpop.f32.mrf.mxu1 }
 0x5cc   : > { %v1144_v6 = vadd.f32 %v2262_v3, %v1143_v4  ;;  %v2285_v3 = vld [vmem:[%s3430_s4 + $0x1] ss:$0 sm:$0xff] }
 0x5cd   : > { %v2456_v7 = vpop.f32.mrf.mxu1 }
 0x5ce   : > { %v1149_v8 = vadd.f32 %v1144_v6, %v3062_v5  ;;  %v2640_v5 = vld [vmem:[%s3435_s9] sm:$0xff]  }
 0x5cf   : > { %v1146_v9 = vpop.f32.mrf.mxu1  ;;  %2461 = vmatpush3.bf16.msra.mxu0 %v2640_v5 }
 0x5d0   : > { %v1152_v10 = vsel %vm565_vm1, %v1149_v8, 0.0  ;;  %2478 = vmatprep.subr.bf16.mxu0 %v2821_v0 }
 0x5d1   : > { %1153 = vadd.xlane.f32.xlu0 %v1152_v10  ;;  %v2457_v12 = vpop.f32.mrf.mxu1 }
 0x65a   : > { %v1154_v13 = vpop.xlane.xlu0 %1153 }
 0x65b   : > { %v1156_v14 = vmul.f32 0.03125, %v1154_v13 }
 0x65d   : > { %v1157_v15 = vsub.f32 %v1149_v8, %v1156_v14 }
 0x65f   : > { %v1158_v16 = vmul.f32 %v1157_v15, %v1157_v15 }
 0x661   : > { %v1159_v17 = vsel %vm565_vm1, %v1158_v16, 0.0 }
 0x662   : > { %1160 = vadd.xlane.f32.xlu1 %v1159_v17 }
 0x6eb   : > { %v1161_v21 = vpop.xlane.xlu1 %1160 }
 0x6ec   : > { %v1162_v22 = vmul.f32 0.03125, %v1161_v21 }
 0x6ee   : > { %v1163_v23 = vadd.f32 1e-05, %v1162_v22 }
 0x6f0   : > { %2671 = vrsqrt.f32 %v1163_v23 }
 0x6fd   : > { %v2672_v24 = vpop.eup %2671 }
 0x6fe   : > { %v1165_v26 = vmul.f32 %v2672_v24, %v1157_v15 }
 0x700   : > { %v1172_v11 = vmul.f32 %v2266_v25, %v1165_v26 }
 0x702   : > { %v1179_v29 = vadd.f32 %v2267_v27, %v1172_v11 }
 0x704   : > { %v1180_v30 = vpack.c.bf16 %v1179_v29, %v1179_v29 }
 0x706   : > { %2463 = vmatmul.mubr.msk.bf16.vlgmr.msra.gmra.mxu0 %vm565_vm1, %v1180_v30 }
 0x707   : > { %2482 = vmatprep.mubr.msk.bf16.mxu0 %vm2822_vm0, %v2821_v0  ;;  %2479 = vmatpush3.bf16.msra.mxu0 %v2645_v54 }
 0x708   : > { %2480 = vmatprep.subr.bf16.mxu0 %v2821_v0 }
 0x70b   : > { %2481 = vmatpush3.bf16.msra.mxu0 %v2646_v55 }
 0x70c   : > { %2486 = vmatprep.subr.bf16.mxu0 %v2821_v0 }
 0x7c6   : > { %v1241_v34 = vpop.f32.mrf.mxu0 }
 0x7c7   : > { %v1242_v35 = vadd.f32 %v2268_v33, %v1241_v34 }
 0x7c8   : > { %v2464_v36 = vpop.f32.mrf.mxu0 }
 0x7c9   : > { %v1247_v37 = vmax.f32 %v1242_v35, 0.0 }
 0x7ca   : > { %v1244_v38 = vpop.f32.mrf.mxu0 }
 0x7cb   : > { %v1248_v39 = vpack.c.bf16 %v1247_v37, %v1247_v37 }
 0x7cc   : > { %v2465_v40 = vpop.f32.mrf.mxu0 }
 0x7cd   : > { %2475 = vmatmul.mubr.msk.bf16.vlgmr.msra.gmra.mxu1 %vm1288_vm6, %v1248_v39 }
 0x7ce   : > { %2494 = vmatprep.mubr.msk.bf16.mxu1 %vm2822_vm0, %v2821_v0 }
 0x88d   : > { %v1326_v42 = vpop.f32.mrf.mxu1 }
 0x88e   : > { %v1327_v43 = vadd.f32 %v2272_v41, %v1326_v42 }
 0x88f   : > { %v2476_v44 = vpop.f32.mrf.mxu1 }
 0x890   : > { %v1332_v45 = vadd.f32 %v1327_v43, %v1179_v29 }
 0x891   : > { %v1329_v46 = vpop.f32.mrf.mxu1 }
 0x892   : > { %v1335_v47 = vsel %vm565_vm1, %v1332_v45, 0.0 }
 0x893   : > { %1336 = vadd.xlane.f32.xlu0 %v1335_v47  ;;  %v2477_v48 = vpop.f32.mrf.mxu1 }
 0x91c   : > { %v1337_v49 = vpop.xlane.xlu0 %1336 }
 0x91d   : > { %v1338_v50 = vmul.f32 0.03125, %v1337_v49 }
 0x91f   : > { %v1339_v51 = vsub.f32 %v1332_v45, %v1338_v50 }
 0x921   : > { %v1340_v52 = vmul.f32 %v1339_v51, %v1339_v51 }
 0x923   : > { %v1341_v53 = vsel %vm565_vm1, %v1340_v52, 0.0 }
 0x924   : > { %1342 = vadd.xlane.f32.xlu0 %v1341_v53 }
 0x9ad   : > { %v1343_v56 = vpop.xlane.xlu0 %1342 }
 0x9ae   : > { %v1344_v57 = vmul.f32 0.03125, %v1343_v56 }
 0x9b0   : > { %v1345_v58 = vadd.f32 1e-05, %v1344_v57 }
 0x9b2   : > { %2673 = vrsqrt.f32 %v1345_v58 }
 0x9bf   : > { %v2674_v59 = vpop.eup %2673 }
 0x9c0   : > { %v1347_v61 = vmul.f32 %v2674_v59, %v1339_v51 }
 0x9c2   : > { %v1354_v63 = vmul.f32 %v2278_v60, %v1347_v61 }
 0x9c4   : > { %v3235_v1 = vadd.f32 %v2279_v62, %v1354_v63 }
 0x9c6   : > { %v1362_v2 = vpack.c.bf16 %v3235_v1, %v3235_v1 }
 0x9c8   : > { %2483 = vmatmul.mubr.msk.bf16.vlgmr.msra.gmra.mxu0 %vm565_vm1, %v1362_v2 }
 0x9c9   : > { %2488 = vmatprep.mubr.msk.bf16.mxu0 %vm2822_vm0, %v2821_v0 }
 0xa88   : > { %v1425_v4 = vpop.f32.mrf.mxu0 }
 0xa89   : > { %v1426_v6 = vadd.f32 %v2285_v3, %v1425_v4 }
 0xa8a   : > { %v2484_v7 = vpop.f32.mrf.mxu0 }
 0xa8b   : > { %v3245_v8 = vpack.c.bf16 %v1426_v6, %v1426_v6 }
 0xa8c   : > { %v1428_v9 = vpop.f32.mrf.mxu0 }
 0xa8d   : > { %1553 = vrot.lane.b32.xlu0 %v3245_v8, %s2826_s16  ;;  %1440 = vrot.lane.b32.xlu1 %v3245_v8, %s2824_s18  ;;  %s3488_s18 = smov 64   ;;  %s3490_s16 = smov 48  }
 0xa8e   : > { %v2485_v10 = vpop.f32.mrf.mxu0 }
 0xa91   : > { %1663 = vrot.lane.b32.xlu0 %v3245_v8, %s2828_s30  ;;  %1551 = vrot.lane.b32.xlu1 %v3245_v8, %s2823_s23  ;;  %s3487_s23 = smov 56   ;;  %s3494_s30 = sld [smem:[#allocation17_spill]] }
 0xa95   : > { %1775 = vrot.lane.b32.xlu0 %v3245_v8, %s2829_s21  ;;  %1665 = vrot.lane.b32.xlu1 %v3245_v8, %s2825_s25  ;;  %s3489_s25 = smov 40   ;;  %s2749_s21 = scalar_lea.vmem %s2157_s26, 16 }
 0xa96   : > { %p2750_p11 = scmp.ne.s32.totalorder %s2157_s26, %s2749_s21 }
 0xa97   : > { %p3497_p13 = scmp.ne.s32.totalorder %s3494_s30, 0 }
 0xa99   : > { %1777 = vrot.lane.b32.xlu1 %v3245_v8, %s2827_s17  ;;  %s3491_s17 = smov 8   ;;  %p2751_p10 = pnand %p2750_p11, %p3497_p13 }
 0xa9b   : > { %p2752_p1 = pneg %p2751_p10 }
 0xaff   : > { %v1441_v12 = vpop.permute.xlu1 %1440  ;;  %v1554_v14 = vpop.permute.xlu0 %1553 }
 0xb00   : > { %v1446_v13 = vsel %vm618_vm2, %v1441_v12, 0  ;;  %v1559_v16 = vsel %vm618_vm2, %v1554_v14, 0 }
 0xb01   : > { %2487 = vmatpush3.bf16.xpose.msra.mxu0 %v1446_v13 }
 0xb02   : > { %2498 = vmatprep.subr.bf16.mxu0 %v2821_v0 }
 0xb03   : > { %v1552_v15 = vpop.permute.xlu1 %1551  ;;  %v1664_v19 = vpop.permute.xlu0 %1663 }
 0xb07   : > { %v1666_v17 = vpop.permute.xlu1 %1665  ;;  %v1776_v21 = vpop.permute.xlu0 %1775 }
 0xb08   : > { %2489 = vmatmul.mubr.msk.bf16.vlgmr.msra.gmra.mxu0 %vm618_vm2, %v3245_v8  ;;  %v1671_v18 = vsel %vm618_vm2, %v1666_v17, 0 }
 0xb09   : > { %2499 = vmatpush3.bf16.xpose.msra.mxu0 %v1559_v16  ;;  %2500 = vmatprep.mubr.msk.bf16.mxu0 %vm2822_vm0, %v2821_v0 }
 0xb0a   : > { %2510 = vmatprep.subr.bf16.mxu0 %v2821_v0 }
 0xb0b   : > { %v1778_v5 = vpop.permute.xlu1 %1777 }
 0xb0c   : > { %v1783_v20 = vsel %vm618_vm2, %v1778_v5, 0 }
 0xb10   : > { %2501 = vmatmul.mubr.msk.bf16.vlgmr.msra.gmra.mxu0 %vm618_vm2, %v1552_v15 }
 0xb11   : > { %2511 = vmatpush3.bf16.xpose.msra.mxu0 %v1671_v18  ;;  %2512 = vmatprep.mubr.msk.bf16.mxu0 %vm2822_vm0, %v2821_v0 }
 0xb12   : > { %2522 = vmatprep.subr.bf16.mxu0 %v2821_v0 }
 0xb18   : > { %2513 = vmatmul.mubr.msk.bf16.vlgmr.msra.gmra.mxu0 %vm618_vm2, %v1664_v19 }
 0xb19   : > { %2523 = vmatpush3.bf16.xpose.msra.mxu0 %v1783_v20  ;;  %2524 = vmatprep.mubr.msk.bf16.mxu0 %vm2822_vm0, %v2821_v0 }
 0xb1a   : > { %2534 = vmatprep.subr.bf16.mxu0 %v2821_v0 }
 0xb20   : > { %2525 = vmatmul.mubr.msk.bf16.vlgmr.msra.gmra.mxu0 %vm618_vm2, %v1776_v21 }
 0xb21   : > { %2538 = vmatprep.mubr.msk.bf16.mxu0 %vm2822_vm0, %v2821_v0 }
 0xbc8   : > { %v1482_v22 = vpop.f32.mrf.mxu0 }
 0xbc9   : > { %v1488_v23 = vmul.f32 0.35355338, %v1482_v22 }
 0xbca   : > { %v2490_v24 = vpop.f32.mrf.mxu0 }
 0xbcb   : > { %v1489_v25 = vadd.f32 %v1488_v23, %v3115_v28 }
 0xbcc   : > { %v1485_v26 = vpop.f32.mrf.mxu0 }
 0xbcd   : > { %v1491_v27 = vsel %vm1490_vm7, %v1489_v25, -inf }
 0xbce   : > { %1492 = vmax.xlane.f32.xlu1 %v1491_v27  ;;  %v2491_v11 = vpop.f32.mrf.mxu0 }
 0xbd0   : > { %v1595_v29 = vpop.f32.mrf.mxu0 }
 0xbd1   : > { %v1601_v30 = vmul.f32 0.35355338, %v1595_v29 }
 0xbd2   : > { %v2502_v31 = vpop.f32.mrf.mxu0 }
 0xbd3   : > { %v1602_v32 = vadd.f32 %v1601_v30, %v3115_v28 }
 0xbd4   : > { %v1598_v33 = vpop.f32.mrf.mxu0 }
 0xbd5   : > { %v1603_v34 = vsel %vm1490_vm7, %v1602_v32, -inf }
 0xbd6   : > { %1604 = vmax.xlane.f32.xlu0 %v1603_v34  ;;  %v2503_v35 = vpop.f32.mrf.mxu0 }
 0xbd8   : > { %v1707_v36 = vpop.f32.mrf.mxu0 }
 0xbd9   : > { %v1713_v37 = vmul.f32 0.35355338, %v1707_v36 }
 0xbda   : > { %v2514_v38 = vpop.f32.mrf.mxu0 }
 0xbdb   : > { %v1714_v39 = vadd.f32 %v1713_v37, %v3115_v28 }
 0xbdc   : > { %v1710_v40 = vpop.f32.mrf.mxu0 }
 0xbdd   : > { %v1715_v41 = vsel %vm1490_vm7, %v1714_v39, -inf  ;;  %v2647_v40 = vld [vmem:[%s3431_s5 + $0x18] sm:$0xff]  }
 0xbde   : > { %1716 = vmax.xlane.f32.xlu0 %v1715_v41  ;;  %v2515_v42 = vpop.f32.mrf.mxu0  ;;  %2535 = vmatpush3.bf16.msra.mxu0 %v2647_v40  ;;  %v2648_v41 = vld [vmem:[%s3431_s5 + $0x10] sm:$0xff]  }
 0xbdf   : > { %2536 = vmatprep.subr.bf16.mxu0 %v2821_v0 }
 0xbe0   : > { %v1819_v43 = vpop.f32.mrf.mxu0 }
 0xbe1   : > { %v1825_v44 = vmul.f32 0.35355338, %v1819_v43 }
 0xbe2   : > { %v2526_v45 = vpop.f32.mrf.mxu0  ;;  %2537 = vmatpush3.bf16.msra.mxu0 %v2648_v41 }
 0xbe3   : > { %v1826_v46 = vadd.f32 %v1825_v44, %v3115_v28  ;;  %2550 = vmatprep.subr.bf16.mxu0 %v2821_v0 }
 0xbe4   : > { %v1822_v47 = vpop.f32.mrf.mxu0 }
 0xbe5   : > { %v1827_v48 = vsel %vm1490_vm7, %v1826_v46, -inf }
 0xbe6   : > { %1828 = vmax.xlane.f32.xlu1 %v1827_v48  ;;  %v2527_v49 = vpop.f32.mrf.mxu0 }
 0xc57   : > { %v1493_v50 = vpop.xlane.xlu1 %1492 }
 0xc58   : > { %v1494_v51 = vsub.f32 %v1489_v25, %v1493_v50 }
 0xc5a   : > { %v1495_v52 = vmul.f32 1.442695, %v1494_v51 }
 0xc5c   : > { %2675 = vpow2.f32 %v1495_v52 }
 0xc5f   : > { %v1605_v53 = vpop.xlane.xlu0 %1604 }
 0xc60   : > { %v1606_v54 = vsub.f32 %v1602_v32, %v1605_v53 }
 0xc62   : > { %v1607_v55 = vmul.f32 1.442695, %v1606_v54 }
 0xc64   : > { %2677 = vpow2.f32 %v1607_v55 }
 0xc67   : > { %v1717_v56 = vpop.xlane.xlu0 %1716 }
 0xc68   : > { %v1718_v57 = vsub.f32 %v1714_v39, %v1717_v56 }
 0xc69   : > { %v2676_v58 = vpop.eup %2675 }
 0xc6a   : > { %v1719_v59 = vmul.f32 1.442695, %v1718_v57  ;;  %v1497_v60 = vsel %vm1490_vm7, %v2676_v58, 0.0  ;;  %v2293_v57 = vld [vmem:[%s3432_s6 + $0x1] sm:$0x1] }
 0xc6b   : > { %1498 = vadd.xlane.f32.xlu0 %v1497_v60 }
 0xc6c   : > { %2679 = vpow2.f32 %v1719_v59 }
 0xc6f   : > { %v1829_v2 = vpop.xlane.xlu1 %1828 }
 0xc70   : > { %v1830_v3 = vsub.f32 %v1826_v46, %v1829_v2 }
 0xc71   : > { %v2678_v28 = vpop.eup %2677 }
 0xc72   : > { %v1609_v61 = vsel %vm1490_vm7, %v2678_v28, 0.0  ;;  %v1831_v4 = vmul.f32 1.442695, %v1830_v3 }
 0xc73   : > { %1610 = vadd.xlane.f32.xlu1 %v1609_v61 }
 0xc74   : > { %2681 = vpow2.f32 %v1831_v4 }
 0xc79   : > { %v2680_v62 = vpop.eup %2679 }
 0xc7a   : > { %v1721_v63 = vsel %vm1490_vm7, %v2680_v62, 0.0 }
 0xc7b   : > { %1722 = vadd.xlane.f32.xlu0 %v1721_v63 }
 0xc81   : > { %v2682_v6 = vpop.eup %2681 }
 0xc82   : > { %v1833_v7 = vsel %vm1490_vm7, %v2682_v6, 0.0 }
 0xc84   : > { %1615 = vrot.lane.b32.xlu1 %v3245_v8, %s3487_s23 }
 0xc91   : > { %1503 = vrot.lane.b32.xlu0 %v3245_v8, %s3488_s18  ;;  %s3495_s18 = sld [smem:[#allocation20_spill]] }
 0xc95   : > { %1839 = vrot.lane.b32.xlu0 %v3245_v8, %s3489_s25 }
 0xc97   : > { %s3496_s25 = smov %s3495_s18 }
 0xca8   : > { %1834 = vadd.xlane.f32.xlu1 %v1833_v7 }
 0xcb9   : > { %1727 = vrot.lane.b32.xlu1 %v3245_v8, %s3490_s16 }
 0xcf4   : > { %v1499_v9 = vpop.xlane.xlu0 %1498 }
 0xcf5   : > { %2683 = vrcp.f32 %v1499_v9  ;;  %v2649_v9 = vld [vmem:[%s3435_s9 + $0x18] sm:$0xff]  }
 0xcfc   : > { %v1611_v10 = vpop.xlane.xlu1 %1610 }
 0xcfd   : > { %2685 = vrcp.f32 %v1611_v10  ;;  %v2651_v10 = vld [vmem:[%s3437_s11 + $0x38] sm:$0xff]  }
 0xd00   : > { %v1616_v17 = vpop.permute.xlu1 %1615 }
 0xd01   : > { %v1621_v19 = vsel %vm690_vm3, %v1616_v17, 0  ;;  %v2305_v17 = vld [vmem:[%s3433_s7 + $0x1] sm:$0x1] }
 0xd02   : > { %v2684_v12 = vpop.eup %2683 }
 0xd03   : > { %v1501_v14 = vmul.f32 %v2684_v12, %v2676_v58  ;;  %v2652_v12 = vld [vmem:[%s3437_s11 + $0x30] sm:$0xff]  }
 0xd04   : > { %v1723_v13 = vpop.xlane.xlu0 %1722 }
 0xd05   : > { %v1502_v18 = vpack.c.bf16 %v1501_v14, %v1501_v14  ;;  %2687 = vrcp.f32 %v1723_v13 }
 0xd08   : > { %v1504_v15 = vpop.permute.xlu0 %1503 }
 0xd09   : > { %v1509_v16 = vsel %vm690_vm3, %v1504_v15, 0 }
 0xd0a   : > { %2493 = vmatpush3.bf16.msra.mxu1 %v1509_v16  ;;  %v2686_v5 = vpop.eup %2685 }
 0xd0b   : > { %2504 = vmatprep.subr.bf16.mxu1 %v2821_v0  ;;  %v1613_v8 = vmul.f32 %v2686_v5, %v2678_v28  ;;  %v2306_v5 = vld [vmem:[%s3434_s8 + $0x1] sm:$0x1] }
 0xd0c   : > { %v1840_v26 = vpop.permute.xlu0 %1839 }
 0xd0d   : > { %2495 = vmatmul.mubr.msk.bf16.vlgmr.msra.gmra.mxu1 %vm618_vm2, %v1502_v18  ;;  %v1614_v20 = vpack.c.bf16 %v1613_v8, %v1613_v8  ;;  %v1845_v11 = vsel %vm690_vm3, %v1840_v26, 0 }
 0xd0e   : > { %2505 = vmatpush3.bf16.msra.mxu1 %v1621_v19  ;;  %2506 = vmatprep.mubr.msk.bf16.mxu1 %vm2822_vm0, %v2821_v0 }
 0xd0f   : > { %2516 = vmatprep.subr.bf16.mxu1 %v2821_v0 }
 0xd12   : > { %v2688_v21 = vpop.eup %2687 }
 0xd13   : > { %v1725_v23 = vmul.f32 %v2688_v21, %v2680_v62  ;;  %v2653_v21 = vld [vmem:[%s3437_s11 + $0x28] sm:$0xff]  }
 0xd15   : > { %2507 = vmatmul.mubr.msk.bf16.vlgmr.msra.gmra.mxu1 %vm618_vm2, %v1614_v20  ;;  %v1726_v27 = vpack.c.bf16 %v1725_v23, %v1725_v23  ;;  %v2311_v23 = vld [vmem:[%s3436_s10 + $0x1] sm:$0x1] }
 0xd16   : > { %2518 = vmatprep.mubr.msk.bf16.mxu1 %vm2822_vm0, %v2821_v0 }
 0xd31   : > { %v1835_v22 = vpop.xlane.xlu1 %1834 }
 0xd32   : > { %2689 = vrcp.f32 %v1835_v22  ;;  %v2654_v22 = vld [vmem:[%s3437_s11 + $0x20] sm:$0xff]  }
 0xd35   : > { %v1728_v24 = vpop.permute.xlu1 %1727 }
 0xd36   : > { %v1733_v25 = vsel %vm690_vm3, %v1728_v24, 0 }
 0xd37   : > { %2517 = vmatpush3.bf16.msra.mxu1 %v1733_v25 }
 0xd38   : > { %2528 = vmatprep.subr.bf16.mxu1 %v2821_v0 }
 0xd3a   : > { %2519 = vmatmul.mubr.msk.bf16.vlgmr.msra.gmra.mxu1 %vm618_vm2, %v1726_v27 }
 0xd3b   : > { %2529 = vmatpush3.bf16.msra.mxu1 %v1845_v11  ;;  %2530 = vmatprep.mubr.msk.bf16.mxu1 %vm2822_vm0, %v2821_v0 }
 0xd3c   : > { %2542 = vmatprep.subr.bf16.mxu1 %v2821_v0 }
 0xd3f   : > { %v2690_v29 = vpop.eup %2689 }
 0xd40   : > { %v1837_v30 = vmul.f32 %v2690_v29, %v2682_v6 }
 0xd42   : > { %v1838_v31 = vpack.c.bf16 %v1837_v30, %v1837_v30 }
 0xd44   : > { %2531 = vmatmul.mubr.msk.bf16.vlgmr.msra.gmra.mxu1 %vm618_vm2, %v1838_v31 }
 0xd45   : > { %2546 = vmatprep.mubr.msk.bf16.mxu1 %vm2822_vm0, %v2821_v0  ;;  %2543 = vmatpush3.bf16.msra.mxu1 %v2649_v9 }
 0xd46   : > { %2544 = vmatprep.subr.bf16.mxu1 %v2821_v0 }
 0xdcd   : > { %v1545_v32 = vpop.f32.mrf.mxu1 }
 0xdcf   : > { %v2496_v33 = vpop.f32.mrf.mxu1 }
 0xdd1   : > { %v1548_v34 = vpop.f32.mrf.mxu1 }
 0xdd3   : > { %v2497_v35 = vpop.f32.mrf.mxu1 }
 0xdd5   : > { %v1657_v36 = vpop.f32.mrf.mxu1 }
 0xdd6   : > { %1888 = vrot.lane.b32.xlu1 %v1657_v36, %s3491_s17  ;;  %s2144_s17 = scalar_lea.sflag [#allocation4], %s3037_s20 }
 0xdd7   : > { %v2508_v37 = vpop.f32.mrf.mxu1 }
 0xdd9   : > { %v1660_v38 = vpop.f32.mrf.mxu1 }
 0xddb   : > { %v2509_v39 = vpop.f32.mrf.mxu1 }
 0xdfa   : > { %v1769_v42 = vpop.f32.mrf.mxu1 }
 0xdfb   : > { %1892 = vrot.lane.b32.xlu0 %v1769_v42, %s3492_s14 }
 0xdfc   : > { %v2520_v43 = vpop.f32.mrf.mxu1 }
 0xdfe   : > { %v1772_v44 = vpop.f32.mrf.mxu1 }
 0xe00   : > { %v2521_v45 = vpop.f32.mrf.mxu1 }
 0xe04   : > { %v1881_v46 = vpop.f32.mrf.mxu1 }
 0xe05   : > { %1896 = vrot.lane.b32.xlu1 %v1881_v46, %s3493_s27  ;;  %s2331_s27 = sshll.u32 %s2939_s22, 4  ;;  %s2755_s22 = scalar_lea.vmem %s2754_s29, 32 }
 0xe06   : > { %v2532_v47 = vpop.f32.mrf.mxu1  ;;  %s2154_s16 = scalar_lea.hbm %s3495_s18, %s2331_s27  ;;  %p2757_p0 = scmp.lt.s32.totalorder %s2755_s22, %s2749_s21 }
 0xe07   : > { %v2329_v47 = vld [vmem:[%s3439_s13 + $0x1] sm:$0x1] }
 0xe08   : > { %v1884_v48 = vpop.f32.mrf.mxu1  ;;  %p2758_p3 = por %p2757_p0, %p2756_p2 }
 0xe0a   : > { %v2533_v49 = vpop.f32.mrf.mxu1  ;;  %p2759_p12 = pnand %p2758_p3, %p2752_p1 }
 0xe0b   : > { %v2330_v49 = vld [vmem:[%s3486_s24 + $0x1] sm:$0x1] }
 0xe48   : > { %v1889_v50 = vpop.permute.xlu1 %1888 }
 0xe49   : > { %v1899_v52 = vsel %vm618_vm2, %v1545_v32, %v1889_v50 }
 0xe6d   : > { %v1893_v51 = vpop.permute.xlu0 %1892 }
 0xe6e   : > { %v1900_v53 = vsel %vm1083_vm4, %v1899_v52, %v1893_v51 }
 0xe77   : > { %v1897_v54 = vpop.permute.xlu1 %1896 }
 0xe78   : > { %v1901_v55 = vsel %vm1085_vm5, %v1900_v53, %v1897_v54 }
 0xe79   : > { %v1902_v56 = vpack.c.bf16 %v1901_v55, %v1901_v55 }
 0xe7b   : > { %2539 = vmatmul.mubr.msk.bf16.vlgmr.msra.gmra.mxu0 %vm565_vm1, %v1902_v56 }
 0xe7c   : > { %2558 = vmatprep.mubr.msk.bf16.mxu0 %vm2822_vm0, %v2821_v0  ;;  %2551 = vmatpush3.bf16.msra.mxu0 %v2651_v10 }
 0xe7d   : > { %2552 = vmatprep.subr.bf16.mxu0 %v2821_v0 }
 0xe80   : > { %2553 = vmatpush3.bf16.msra.mxu0 %v2652_v12 }
 0xe81   : > { %2554 = vmatprep.subr.bf16.mxu0 %v2821_v0 }
 0xe84   : > { %2555 = vmatpush3.bf16.msra.mxu0 %v2653_v21 }
 0xe85   : > { %2556 = vmatprep.subr.bf16.mxu0 %v2821_v0  ;;  %v2323_v0 = vld [vmem:[%s3438_s12 + $0x1] sm:$0x1] }
 0xe88   : > { %2557 = vmatpush3.bf16.msra.mxu0 %v2654_v22 }
 0xf3b   : > { %v1952_v58 = vpop.f32.mrf.mxu0 }
 0xf3c   : > { %v1953_v59 = vadd.f32 %v2293_v57, %v1952_v58 }
 0xf3d   : > { %v2540_v60 = vpop.f32.mrf.mxu0 }
 0xf3e   : > { %v1958_v28 = vadd.f32 %v1953_v59, %v3235_v1  ;;  %v2650_v1 = vld [vmem:[%s3435_s9 + $0x10] sm:$0xff]  }
 0xf3f   : > { %v1955_v61 = vpop.f32.mrf.mxu0  ;;  %2545 = vmatpush3.bf16.msra.mxu1 %v2650_v1 }
 0xf40   : > { %v1964_v62 = vsel %vm1963_vm8, %v1958_v28, 0.0 }
 0xf41   : > { %1965 = vadd.xlane.f32.xlu0 %v1964_v62  ;;  %v2541_v63 = vpop.f32.mrf.mxu0 }
 0xfca   : > { %v1966_v2 = vpop.xlane.xlu0 %1965 }
 0xfcb   : > { %v1967_v3 = vmul.f32 0.03125, %v1966_v2 }
 0xfcd   : > { %v1968_v4 = vsub.f32 %v1958_v28, %v1967_v3 }
 0xfcf   : > { %v1969_v6 = vmul.f32 %v1968_v4, %v1968_v4 }
 0xfd1   : > { %v1970_v7 = vsel %vm1963_vm8, %v1969_v6, 0.0 }
 0xfd2   : > { %1971 = vadd.xlane.f32.xlu1 %v1970_v7 }
0x105b   : > { %v1972_v13 = vpop.xlane.xlu1 %1971 }
0x105c   : > { %v1973_v14 = vmul.f32 0.03125, %v1972_v13 }
0x105e   : > { %v1974_v15 = vadd.f32 1e-05, %v1973_v14 }
0x1060   : > { %2691 = vrsqrt.f32 %v1974_v15 }
0x106d   : > { %v2692_v16 = vpop.eup %2691 }
0x106e   : > { %v1976_v18 = vmul.f32 %v2692_v16, %v1968_v4 }
0x1070   : > { %v1977_v19 = vmul.f32 %v2305_v17, %v1976_v18 }
0x1072   : > { %v1978_v8 = vadd.f32 %v2306_v5, %v1977_v19 }
0x1074   : > { %v1979_v20 = vpack.c.bf16 %v1978_v8, %v1978_v8 }
0x1076   : > { %2547 = vmatmul.mubr.msk.bf16.vlgmr.msra.gmra.mxu1 %vm565_vm1, %v1979_v20 }
0x1136   : > { %v2036_v24 = vpop.f32.mrf.mxu1 }
0x1137   : > { %v2037_v25 = vadd.f32 %v2311_v23, %v2036_v24 }
0x1138   : > { %v2548_v26 = vpop.f32.mrf.mxu1 }
0x1139   : > { %v2042_v27 = vmax.f32 %v2037_v25, 0.0 }
0x113a   : > { %v2039_v11 = vpop.f32.mrf.mxu1 }
0x113b   : > { %v2043_v29 = vpack.c.bf16 %v2042_v27, %v2042_v27 }
0x113c   : > { %v2549_v30 = vpop.f32.mrf.mxu1 }
0x113d   : > { %2559 = vmatmul.mubr.msk.bf16.vlgmr.msra.gmra.mxu0 %vm1288_vm6, %v2043_v29 }
0x11fd   : > { %v2116_v31 = vpop.f32.mrf.mxu0 }
0x11fe   : > { %v2117_v32 = vadd.f32 %v2323_v0, %v2116_v31 }
0x11ff   : > { %v2560_v33 = vpop.f32.mrf.mxu0 }
0x1200   : > { %v2122_v34 = vadd.f32 %v2117_v32, %v1978_v8 }
0x1201   : > { %v2119_v35 = vpop.f32.mrf.mxu0 }
0x1202   : > { %v2127_v36 = vsel %vm1963_vm8, %v2122_v34, 0.0 }
0x1203   : > { %2128 = vadd.xlane.f32.xlu0 %v2127_v36  ;;  %v2561_v37 = vpop.f32.mrf.mxu0 }
0x128c   : > { %v2129_v38 = vpop.xlane.xlu0 %2128 }
0x128d   : > { %v2130_v39 = vmul.f32 0.03125, %v2129_v38 }
0x128f   : > { %v2131_v40 = vsub.f32 %v2122_v34, %v2130_v39 }
0x1291   : > { %v2132_v41 = vmul.f32 %v2131_v40, %v2131_v40 }
0x1293   : > { %v2133_v42 = vsel %vm1963_vm8, %v2132_v41, 0.0 }
0x1294   : > { %2134 = vadd.xlane.f32.xlu0 %v2133_v42 }
0x131d   : > { %v2135_v43 = vpop.xlane.xlu0 %2134 }
0x131e   : > { %v2136_v44 = vmul.f32 0.03125, %v2135_v43 }
0x1320   : > { %v2137_v45 = vadd.f32 1e-05, %v2136_v44 }
0x1322   : > { %2693 = vrsqrt.f32 %v2137_v45 }
0x132f   : > { %v2694_v46 = vpop.eup %2693 }
0x1330   : > { %v2139_v48 = vmul.f32 %v2694_v46, %v2131_v40 }
0x1332   : > { %v2140_v50 = vmul.f32 %v2329_v47, %v2139_v48 }
0x1334   : > { %v2141_v51 = vadd.f32 %v2330_v49, %v2140_v50 }
0x1336   : > { %2142 = vst.msk [vmem:[%s532_s15] sm:$0x1] %vm1963_vm8, %v2141_v51 }
0x1337   : > { %2762 = shalt.err (!%p2759_p12)
}
0x1338   : > { %s2763_s14 = scalar_lea.hbm %s2154_s16, 16  ;;  %s2767_s15 = scalar_lea.hbm %s3496_s25, 32 }
0x1339   : > { %p2764_p5 = scmp.ne.s32.totalorder %s2154_s16, %s2763_s14  ;;  %p2768_p4 = scmp.lt.s32.totalorder %s2154_s16, %s3496_s25 }
0x133a   : > { %p2769_p8 = scmp.lt.s32.totalorder %s2767_s15, %s2763_s14 }
0x133b   : > { %p2765_p7 = pnand %p2764_p5, %p3497_p13 }
0x133c   : > { %p2770_p9 = por %p2769_p8, %p2768_p4 }
0x133d   : > { %p2766_p6 = pneg %p2765_p7 }
0x133f   : > { %p2771_p11 = pnand %p2770_p9, %p2766_p6 }
0x1341   : > { %2774 = shalt.err (!%p2771_p11)
}
0x1342   : > { %2568 = dma.vmem_to_hbm [thread:$0]  (%p3497_p13), %s2157_s26, 16, %s2154_s16, %s2144_s17  }
0x1343 PF: > { %s3498_s18 = sld [smem:[#allocation11_spill]] }
0x1344   : > { %s3499_s21 = sld [smem:[#allocation14_spill]] }
0x1345   : > { %s3500_s1 = sld [smem:[#allocation13_spill]] }
0x1349   : > { %s2168_s29 = sand.u32 1, %s3498_s18  }
0x134a   : > { %p3501_p10 = scmp.ne.s32.totalorder %s3499_s21, 0  ;;  %s2169_s22 = scalar_lea.sflag [#allocation4], %s2168_s29 }
0x134b   : > { %p3502_p1 = scmp.ge.s32.totalorder %s3500_s1, 2 }
0x134d   : > { %p2579_p2 = pnand %p3502_p1, %p3501_p10 }
0x134f   : > { %p2580_p0 = pneg %p2579_p2 }
0x1351   : > { %2800 = dma.done.wait (%p2580_p0), %s2169_s22, 16  }
0x1352   : > { %2802 = vsyncadd (%p2580_p0), %s2169_s22, 4294967280  ;;  %s3503_s21 = sld [smem:[#allocation15_spill]]  ;;  %s3506_s18 = smov %s2809_s19 }
0x1353   : > { %s3504_s14 = sld [smem:[#allocation12_spill]] }
0x1354   : > { %s3505_s20 = sld [smem:[#allocation16_spill]] }
0x1358   : > { %p29_p3 = scmp.ge.s32.totalorder %s3503_s21, 4  }
0x1359   : > { %s3507_s19 = smov %s3504_s14 }
0x135a   :  { %31 = sbr.rel (!%p29_p3) target bundleno = 10 (0xa), region = 144 }
0x135f   :  { %2173 = vsyncpa [#allocation3], 1 }
0x1360   :  { %2175 = vsyncpa [#allocation3 + $0x1], 1 }
0x1361   :  { %2176 = vsyncpa [#allocation6], 1 }
0x1362   :  { %2177 = vsyncpa [#allocation4], 1 }
0x1363   :  { %2179 = vsyncpa [#allocation4 + $0x1], 1 }

</bundles_post_ra>
